<compile_context>
chip_gen: v7x
topology: tpu7x:2x2x1
jax: 0.10.0
libtpu: 0.0.40
codegen_flags: <defaults>
</compile_context>

<pallas_src>
import functools

import jax
import jax.numpy as jnp
from jax import lax
from jax.experimental import pallas as pl
from jax.experimental.pallas import tpu as pltpu


def _round_up(x, m):
    return ((x + m - 1) // m) * m


# ---------------------------------------------------------------------------
# Fused kernel: BatchNorm -> GRU recurrence -> Linear/softmax/cumsum/clamp
# ---------------------------------------------------------------------------

def neudp_kernel(x_ref, gamma_ref, beta_ref,
                 wih_ref, bih_ref, whh_ref, bhh_ref,
                 wout_ref, bout_ref, o_ref, *, hidden_dim):
    """All-in-one NeuDP forward.

    x_ref    : (T, N, D)  f32   daily_data_batch in native layout
    gamma_ref: (T, 1, D)        BatchNorm affine scale  (feature = (t, d))
    beta_ref : (T, 1, D)        BatchNorm affine shift
    wih_ref  : (D, Kp)          packed input->hidden weights [r|z|n|pad], Kp = roundup(3H,128)
    bih_ref  : (1, Kp)
    whh_ref  : (H, Kp)          packed hidden->hidden weights [r|z|n|pad]
    bhh_ref  : (1, Kp)
    wout_ref : (H, O), bout_ref : (1, O)
    o_ref    : (N, O)
    """
    T, N, D = x_ref.shape
    H = hidden_dim
    Kp = wih_ref.shape[1]
    O = wout_ref.shape[1]

    # ---- BatchNorm1d (training-mode stats) directly on (T, N, D) ----------
    # mean/var over the company axis N per (t, d) feature == the PyTorch
    # (N, T*D) BatchNorm1d math; no transpose/reshape glue needed.
    x = x_ref[...]
    mean = jnp.mean(x, axis=1, keepdims=True)                     # (T, 1, D)
    var = jnp.mean((x - mean) ** 2, axis=1, keepdims=True)        # biased var
    x_norm = (x - mean) * lax.rsqrt(var + 1e-5) * gamma_ref[...] + beta_ref[...]

    # ---- Hoisted GRU input projection: one matmul for all time steps ------
    ix = jnp.dot(x_norm.reshape(T * N, D), wih_ref[...],
                 preferred_element_type=jnp.float32) + bih_ref[...]  # (T*N, Kp)
    ix = ix.reshape(T, N, Kp)

    # Hoist recurrent weight load + bias broadcast out of the unrolled loop
    # (Mosaic will not reliably CSE ref reads / broadcast_in_dim across an
    # unrolled body).
    whh = whh_ref[...]                                   # (H, Kp) -> 4 vregs
    bhh = jnp.broadcast_to(bhh_ref[...], (N, Kp))

    # ---- GRU recurrence: h lives in vregs, T fully unrolled ---------------
    h = jnp.zeros((N, H), jnp.float32)
    for t in range(T):                                   # T is static -> unrolled
        hg = jnp.dot(h, whh,
                     preferred_element_type=jnp.float32) + bhh      # (N, Kp)
        it = ix[t]                                                   # (N, Kp)
        # one sigmoid over the contiguous r|z lane band, then split
        rz = jax.nn.sigmoid(it[:, 0:2 * H] + hg[:, 0:2 * H])
        r = rz[:, 0:H]
        z = rz[:, H:2 * H]
        n = jnp.tanh(it[:, 2 * H:3 * H] + r * hg[:, 2 * H:3 * H])
        h = (1.0 - z) * n + z * h

    # ---- Head: Linear -> softmax(axis=1) -> cumsum(axis=1) -> clamp -------
    logits = jnp.dot(h, wout_ref[...],
                     preferred_element_type=jnp.float32) + bout_ref[...]  # (N, O)
    m = jnp.max(logits, axis=1, keepdims=True)
    e = jnp.exp(logits - m)
    p = e / jnp.sum(e, axis=1, keepdims=True)            # exact divide (parity)

    # cumsum along axis=1: O is tiny & static -> unrolled VPU prefix sum
    # (no MXU push/pop at the tail of the serial chain).
    acc = p[:, 0:1]
    parts = [acc]
    for j in range(1, O):
        acc = acc + p[:, j:j + 1]
        parts.append(acc)
    c = jnp.concatenate(parts, axis=1)                   # (N, O)

    eps = 5e-8
    o_ref[...] = jnp.clip(c, eps, 1.0 - eps)


# ---------------------------------------------------------------------------
# Wrapper (whole problem fits in VMEM; no grid needed at these shapes)
# ---------------------------------------------------------------------------

_VMEM = pl.BlockSpec(memory_space=pltpu.MemorySpace.VMEM)


@jax.jit
def neudp_forward(daily_data_batch, params):
    T, N, D = daily_data_batch.shape
    H = params["w_hh"].shape[0]
    Kp = params["w_ih"].shape[1]
    O = params["w_out"].shape[1]

    # Advisory cost estimate so XLA can schedule surrounding ops sensibly.
    flops = (
        6 * T * N * D                         # batchnorm
        + 2 * T * N * D * Kp                  # hoisted input projection
        + T * (2 * N * H * Kp + 12 * N * H)   # recurrence matmul + gate math
        + 2 * N * H * O + 8 * N * O           # head linear + softmax + cumsum
    )
    transcendentals = T * N * 3 * H + N * O   # sigmoid/tanh + exp
    bytes_accessed = 4 * (
        T * N * D + 2 * T * D                 # x, gamma, beta
        + (D + H + 2) * Kp                    # GRU weights/biases (padded)
        + (H + 1) * O                         # head weights/bias
        + N * O                               # output
    )

    kernel = functools.partial(neudp_kernel, hidden_dim=H)
    return pl.pallas_call(
        kernel,
        out_shape=jax.ShapeDtypeStruct((N, O), jnp.float32),
        in_specs=[_VMEM] * 9,
        out_specs=_VMEM,
        cost_estimate=pl.CostEstimate(
            flops=flops,
            transcendentals=transcendentals,
            bytes_accessed=bytes_accessed,
        ),
    )(daily_data_batch,
      params["bn_gamma"], params["bn_beta"],
      params["w_ih"], params["b_ih"], params["w_hh"], params["b_hh"],
      params["w_out"], params["b_out"])


def init_params(key, input_dim, window_size, output_dim, hidden_dim):
    ks = jax.random.split(key, 6)
    k = 1.0 / jnp.sqrt(hidden_dim)
    Kp = _round_up(3 * hidden_dim, 128)            # pad gates to full lane width

    def pad_cols(a):
        return jnp.pad(a, ((0, 0), (0, Kp - 3 * hidden_dim)))

    # GRUCell weights packed as [r | z | n] along the last (lane) dimension,
    # stored transposed for `x @ W`.
    w_ih = jax.random.uniform(ks[0], (input_dim, 3 * hidden_dim), jnp.float32, -k, k)
    w_hh = jax.random.uniform(ks[1], (hidden_dim, 3 * hidden_dim), jnp.float32, -k, k)
    b_ih = jax.random.uniform(ks[2], (1, 3 * hidden_dim), jnp.float32, -k, k)
    b_hh = jax.random.uniform(ks[3], (1, 3 * hidden_dim), jnp.float32, -k, k)

    params = {
        # BatchNorm1d default affine init; feature index = (t, d)
        "bn_gamma": jnp.ones((window_size, 1, input_dim), jnp.float32),
        "bn_beta": jnp.zeros((window_size, 1, input_dim), jnp.float32),
        "w_ih": pad_cols(w_ih),
        "w_hh": pad_cols(w_hh),
        "b_ih": pad_cols(b_ih),
        "b_hh": pad_cols(b_hh),
        # Output linear layer (H, O) + bias
        "w_out": jax.random.uniform(ks[4], (hidden_dim, output_dim),
                                    jnp.float32, -k, k),
        "b_out": jax.random.uniform(ks[5], (1, output_dim),
                                    jnp.float32, -k, k),
    }
    return params


if __name__ == "__main__":
    # small, module-consistent shapes
    input_dim = 4
    window_size = 8
    output_dim = 4
    lstm_hidn_dim = 32
    num_company = 16

    key = jax.random.PRNGKey(0)
    k_x, k_p = jax.random.split(key)

    # daily_data_batch: (window_size, num_company, input_dim)
    x = jax.random.normal(k_x, (window_size, num_company, input_dim), jnp.float32)
    params = init_params(k_p, input_dim, window_size, output_dim, lstm_hidn_dim)

    out = neudp_forward(x, params)
    out = jax.block_until_ready(out)

    assert out.shape == (num_company, output_dim)
    assert bool(jnp.all(jnp.isfinite(out)))
    # outputs are cumulative softmax probabilities -> monotone, in (0, 1]
    assert bool(jnp.all(out[:, 1:] >= out[:, :-1] - 1e-6))
    print("KERNEL_OK")
</pallas_src>

<mosaic_0001>
module attributes {stable_mosaic.version = 11 : i64} {
  func.func @neudp_kernel(%arg0: memref<8x16x4xf32, #tpu.memory_space<vmem>>, %arg1: memref<8x1x4xf32, #tpu.memory_space<vmem>>, %arg2: memref<8x1x4xf32, #tpu.memory_space<vmem>>, %arg3: memref<4x128xf32, #tpu.memory_space<vmem>>, %arg4: memref<1x128xf32, #tpu.memory_space<vmem>>, %arg5: memref<32x128xf32, #tpu.memory_space<vmem>>, %arg6: memref<1x128xf32, #tpu.memory_space<vmem>>, %arg7: memref<32x4xf32, #tpu.memory_space<vmem>>, %arg8: memref<1x4xf32, #tpu.memory_space<vmem>>, %arg9: memref<16x4xf32, #tpu.memory_space<vmem>>) attributes {dimension_semantics = [], scalar_prefetch = 0 : i64, scratch_operands = 0 : i64, tpu.core_type = #tpu.core_type<tc>} {
    %c0 = arith.constant 0 : index
    %c0_0 = arith.constant 0 : index
    %c0_1 = arith.constant 0 : index
    %0 = vector.load %arg0[%c0, %c0_0, %c0_1] : memref<8x16x4xf32, #tpu.memory_space<vmem>>, vector<8x16x4xf32>
    %cst = arith.constant dense<0.000000e+00> : vector<8x4xf32>
    %1 = vector.multi_reduction <add>, %0, %cst [1] : vector<8x16x4xf32> to vector<8x4xf32>
    %2 = vector.shape_cast %1 : vector<8x4xf32> to vector<8x1x4xf32>
    %cst_2 = arith.constant 1.600000e+01 : f32
    %3 = vector.broadcast %cst_2 : f32 to vector<8x1x4xf32>
    %4 = arith.divf %2, %3 : vector<8x1x4xf32>
    %5 = vector.broadcast %4 : vector<8x1x4xf32> to vector<8x16x4xf32>
    %6 = arith.subf %0, %5 : vector<8x16x4xf32>
    %7 = arith.mulf %6, %6 : vector<8x16x4xf32>
    %cst_3 = arith.constant dense<0.000000e+00> : vector<8x4xf32>
    %8 = vector.multi_reduction <add>, %7, %cst_3 [1] : vector<8x16x4xf32> to vector<8x4xf32>
    %9 = vector.shape_cast %8 : vector<8x4xf32> to vector<8x1x4xf32>
    %cst_4 = arith.constant 1.600000e+01 : f32
    %10 = vector.broadcast %cst_4 : f32 to vector<8x1x4xf32>
    %11 = arith.divf %9, %10 : vector<8x1x4xf32>
    %12 = vector.broadcast %4 : vector<8x1x4xf32> to vector<8x16x4xf32>
    %13 = arith.subf %0, %12 : vector<8x16x4xf32>
    %cst_5 = arith.constant 9.99999974E-6 : f32
    %14 = vector.broadcast %cst_5 : f32 to vector<8x1x4xf32>
    %15 = arith.addf %11, %14 : vector<8x1x4xf32>
    %16 = math.rsqrt %15 : vector<8x1x4xf32>
    %17 = vector.broadcast %16 : vector<8x1x4xf32> to vector<8x16x4xf32>
    %18 = arith.mulf %13, %17 : vector<8x16x4xf32>
    %c0_6 = arith.constant 0 : index
    %c0_7 = arith.constant 0 : index
    %c0_8 = arith.constant 0 : index
    %19 = vector.load %arg1[%c0_6, %c0_7, %c0_8] : memref<8x1x4xf32, #tpu.memory_space<vmem>>, vector<8x1x4xf32>
    %20 = vector.broadcast %19 : vector<8x1x4xf32> to vector<8x16x4xf32>
    %21 = arith.mulf %18, %20 : vector<8x16x4xf32>
    %c0_9 = arith.constant 0 : index
    %c0_10 = arith.constant 0 : index
    %c0_11 = arith.constant 0 : index
    %22 = vector.load %arg2[%c0_9, %c0_10, %c0_11] : memref<8x1x4xf32, #tpu.memory_space<vmem>>, vector<8x1x4xf32>
    %23 = vector.broadcast %22 : vector<8x1x4xf32> to vector<8x16x4xf32>
    %24 = arith.addf %21, %23 : vector<8x16x4xf32>
    %25 = vector.shape_cast %24 : vector<8x16x4xf32> to vector<128x4xf32>
    %c0_12 = arith.constant 0 : index
    %c0_13 = arith.constant 0 : index
    %26 = vector.load %arg3[%c0_12, %c0_13] : memref<4x128xf32, #tpu.memory_space<vmem>>, vector<4x128xf32>
    %cst_14 = arith.constant dense<0.000000e+00> : vector<128x128xf32>
    %27 = tpu.matmul %25, %26, %cst_14 {dimension_numbers = #tpu.dot_dimension_numbers<[1], [0], [0], [1], [0, 0, 1, 1], [], []>} : vector<128x4xf32>, vector<4x128xf32>, vector<128x128xf32> -> vector<128x128xf32>
    %c0_15 = arith.constant 0 : index
    %c0_16 = arith.constant 0 : index
    %28 = vector.load %arg4[%c0_15, %c0_16] : memref<1x128xf32, #tpu.memory_space<vmem>>, vector<1x128xf32>
    %29 = vector.broadcast %28 : vector<1x128xf32> to vector<128x128xf32>
    %30 = arith.addf %27, %29 : vector<128x128xf32>
    %31 = vector.shape_cast %30 : vector<128x128xf32> to vector<8x16x128xf32>
    %c0_17 = arith.constant 0 : index
    %c0_18 = arith.constant 0 : index
    %32 = vector.load %arg5[%c0_17, %c0_18] : memref<32x128xf32, #tpu.memory_space<vmem>>, vector<32x128xf32>
    %c0_19 = arith.constant 0 : index
    %c0_20 = arith.constant 0 : index
    %33 = vector.load %arg6[%c0_19, %c0_20] : memref<1x128xf32, #tpu.memory_space<vmem>>, vector<1x128xf32>
    %34 = vector.shape_cast %33 : vector<1x128xf32> to vector<1x128xf32>
    %35 = vector.broadcast %34 : vector<1x128xf32> to vector<16x128xf32>
    %cst_21 = arith.constant 0.000000e+00 : f32
    %36 = vector.broadcast %cst_21 : f32 to vector<16x32xf32>
    %cst_22 = arith.constant dense<0.000000e+00> : vector<16x128xf32>
    %37 = tpu.matmul %36, %32, %cst_22 {dimension_numbers = #tpu.dot_dimension_numbers<[1], [0], [0], [1], [0, 0, 1, 1], [], []>} : vector<16x32xf32>, vector<32x128xf32>, vector<16x128xf32> -> vector<16x128xf32>
    %38 = arith.addf %37, %35 : vector<16x128xf32>
    %39 = vector.extract_strided_slice %31 {offsets = [0, 0, 0], sizes = [1, 16, 128], strides = [1, 1, 1]} : vector<8x16x128xf32> to vector<1x16x128xf32>
    %40 = vector.shape_cast %39 : vector<1x16x128xf32> to vector<16x128xf32>
    %41 = vector.extract_strided_slice %40 {offsets = [0, 0], sizes = [16, 64], strides = [1, 1]} : vector<16x128xf32> to vector<16x64xf32>
    %42 = vector.extract_strided_slice %38 {offsets = [0, 0], sizes = [16, 64], strides = [1, 1]} : vector<16x128xf32> to vector<16x64xf32>
    %43 = arith.addf %41, %42 : vector<16x64xf32>
    %44 = arith.negf %43 : vector<16x64xf32>
    %45 = math.exp %44 : vector<16x64xf32>
    %cst_23 = arith.constant 1.000000e+00 : f32
    %46 = vector.broadcast %cst_23 : f32 to vector<16x64xf32>
    %47 = arith.addf %46, %45 : vector<16x64xf32>
    %48 = arith.divf %46, %47 : vector<16x64xf32>
    %49 = vector.extract_strided_slice %48 {offsets = [0, 0], sizes = [16, 32], strides = [1, 1]} : vector<16x64xf32> to vector<16x32xf32>
    %50 = vector.extract_strided_slice %48 {offsets = [0, 32], sizes = [16, 32], strides = [1, 1]} : vector<16x64xf32> to vector<16x32xf32>
    %51 = vector.extract_strided_slice %40 {offsets = [0, 64], sizes = [16, 32], strides = [1, 1]} : vector<16x128xf32> to vector<16x32xf32>
    %52 = vector.extract_strided_slice %38 {offsets = [0, 64], sizes = [16, 32], strides = [1, 1]} : vector<16x128xf32> to vector<16x32xf32>
    %53 = arith.mulf %49, %52 : vector<16x32xf32>
    %54 = arith.addf %51, %53 : vector<16x32xf32>
    %55 = math.tanh %54 : vector<16x32xf32>
    %cst_24 = arith.constant 1.000000e+00 : f32
    %56 = vector.broadcast %cst_24 : f32 to vector<16x32xf32>
    %57 = arith.subf %56, %50 : vector<16x32xf32>
    %58 = arith.mulf %57, %55 : vector<16x32xf32>
    %59 = arith.mulf %50, %36 : vector<16x32xf32>
    %60 = arith.addf %58, %59 : vector<16x32xf32>
    %cst_25 = arith.constant dense<0.000000e+00> : vector<16x128xf32>
    %61 = tpu.matmul %60, %32, %cst_25 {dimension_numbers = #tpu.dot_dimension_numbers<[1], [0], [0], [1], [0, 0, 1, 1], [], []>} : vector<16x32xf32>, vector<32x128xf32>, vector<16x128xf32> -> vector<16x128xf32>
    %62 = arith.addf %61, %35 : vector<16x128xf32>
    %63 = vector.extract_strided_slice %31 {offsets = [1, 0, 0], sizes = [1, 16, 128], strides = [1, 1, 1]} : vector<8x16x128xf32> to vector<1x16x128xf32>
    %64 = vector.shape_cast %63 : vector<1x16x128xf32> to vector<16x128xf32>
    %65 = vector.extract_strided_slice %64 {offsets = [0, 0], sizes = [16, 64], strides = [1, 1]} : vector<16x128xf32> to vector<16x64xf32>
    %66 = vector.extract_strided_slice %62 {offsets = [0, 0], sizes = [16, 64], strides = [1, 1]} : vector<16x128xf32> to vector<16x64xf32>
    %67 = arith.addf %65, %66 : vector<16x64xf32>
    %68 = arith.negf %67 : vector<16x64xf32>
    %69 = math.exp %68 : vector<16x64xf32>
    %cst_26 = arith.constant 1.000000e+00 : f32
    %70 = vector.broadcast %cst_26 : f32 to vector<16x64xf32>
    %71 = arith.addf %70, %69 : vector<16x64xf32>
    %72 = arith.divf %70, %71 : vector<16x64xf32>
    %73 = vector.extract_strided_slice %72 {offsets = [0, 0], sizes = [16, 32], strides = [1, 1]} : vector<16x64xf32> to vector<16x32xf32>
    %74 = vector.extract_strided_slice %72 {offsets = [0, 32], sizes = [16, 32], strides = [1, 1]} : vector<16x64xf32> to vector<16x32xf32>
    %75 = vector.extract_strided_slice %64 {offsets = [0, 64], sizes = [16, 32], strides = [1, 1]} : vector<16x128xf32> to vector<16x32xf32>
    %76 = vector.extract_strided_slice %62 {offsets = [0, 64], sizes = [16, 32], strides = [1, 1]} : vector<16x128xf32> to vector<16x32xf32>
    %77 = arith.mulf %73, %76 : vector<16x32xf32>
    %78 = arith.addf %75, %77 : vector<16x32xf32>
    %79 = math.tanh %78 : vector<16x32xf32>
    %cst_27 = arith.constant 1.000000e+00 : f32
    %80 = vector.broadcast %cst_27 : f32 to vector<16x32xf32>
    %81 = arith.subf %80, %74 : vector<16x32xf32>
    %82 = arith.mulf %81, %79 : vector<16x32xf32>
    %83 = arith.mulf %74, %60 : vector<16x32xf32>
    %84 = arith.addf %82, %83 : vector<16x32xf32>
    %cst_28 = arith.constant dense<0.000000e+00> : vector<16x128xf32>
    %85 = tpu.matmul %84, %32, %cst_28 {dimension_numbers = #tpu.dot_dimension_numbers<[1], [0], [0], [1], [0, 0, 1, 1], [], []>} : vector<16x32xf32>, vector<32x128xf32>, vector<16x128xf32> -> vector<16x128xf32>
    %86 = arith.addf %85, %35 : vector<16x128xf32>
    %87 = vector.extract_strided_slice %31 {offsets = [2, 0, 0], sizes = [1, 16, 128], strides = [1, 1, 1]} : vector<8x16x128xf32> to vector<1x16x128xf32>
    %88 = vector.shape_cast %87 : vector<1x16x128xf32> to vector<16x128xf32>
    %89 = vector.extract_strided_slice %88 {offsets = [0, 0], sizes = [16, 64], strides = [1, 1]} : vector<16x128xf32> to vector<16x64xf32>
    %90 = vector.extract_strided_slice %86 {offsets = [0, 0], sizes = [16, 64], strides = [1, 1]} : vector<16x128xf32> to vector<16x64xf32>
    %91 = arith.addf %89, %90 : vector<16x64xf32>
    %92 = arith.negf %91 : vector<16x64xf32>
    %93 = math.exp %92 : vector<16x64xf32>
    %cst_29 = arith.constant 1.000000e+00 : f32
    %94 = vector.broadcast %cst_29 : f32 to vector<16x64xf32>
    %95 = arith.addf %94, %93 : vector<16x64xf32>
    %96 = arith.divf %94, %95 : vector<16x64xf32>
    %97 = vector.extract_strided_slice %96 {offsets = [0, 0], sizes = [16, 32], strides = [1, 1]} : vector<16x64xf32> to vector<16x32xf32>
    %98 = vector.extract_strided_slice %96 {offsets = [0, 32], sizes = [16, 32], strides = [1, 1]} : vector<16x64xf32> to vector<16x32xf32>
    %99 = vector.extract_strided_slice %88 {offsets = [0, 64], sizes = [16, 32], strides = [1, 1]} : vector<16x128xf32> to vector<16x32xf32>
    %100 = vector.extract_strided_slice %86 {offsets = [0, 64], sizes = [16, 32], strides = [1, 1]} : vector<16x128xf32> to vector<16x32xf32>
    %101 = arith.mulf %97, %100 : vector<16x32xf32>
    %102 = arith.addf %99, %101 : vector<16x32xf32>
    %103 = math.tanh %102 : vector<16x32xf32>
    %cst_30 = arith.constant 1.000000e+00 : f32
    %104 = vector.broadcast %cst_30 : f32 to vector<16x32xf32>
    %105 = arith.subf %104, %98 : vector<16x32xf32>
    %106 = arith.mulf %105, %103 : vector<16x32xf32>
    %107 = arith.mulf %98, %84 : vector<16x32xf32>
    %108 = arith.addf %106, %107 : vector<16x32xf32>
    %cst_31 = arith.constant dense<0.000000e+00> : vector<16x128xf32>
    %109 = tpu.matmul %108, %32, %cst_31 {dimension_numbers = #tpu.dot_dimension_numbers<[1], [0], [0], [1], [0, 0, 1, 1], [], []>} : vector<16x32xf32>, vector<32x128xf32>, vector<16x128xf32> -> vector<16x128xf32>
    %110 = arith.addf %109, %35 : vector<16x128xf32>
    %111 = vector.extract_strided_slice %31 {offsets = [3, 0, 0], sizes = [1, 16, 128], strides = [1, 1, 1]} : vector<8x16x128xf32> to vector<1x16x128xf32>
    %112 = vector.shape_cast %111 : vector<1x16x128xf32> to vector<16x128xf32>
    %113 = vector.extract_strided_slice %112 {offsets = [0, 0], sizes = [16, 64], strides = [1, 1]} : vector<16x128xf32> to vector<16x64xf32>
    %114 = vector.extract_strided_slice %110 {offsets = [0, 0], sizes = [16, 64], strides = [1, 1]} : vector<16x128xf32> to vector<16x64xf32>
    %115 = arith.addf %113, %114 : vector<16x64xf32>
    %116 = arith.negf %115 : vector<16x64xf32>
    %117 = math.exp %116 : vector<16x64xf32>
    %cst_32 = arith.constant 1.000000e+00 : f32
    %118 = vector.broadcast %cst_32 : f32 to vector<16x64xf32>
    %119 = arith.addf %118, %117 : vector<16x64xf32>
    %120 = arith.divf %118, %119 : vector<16x64xf32>
    %121 = vector.extract_strided_slice %120 {offsets = [0, 0], sizes = [16, 32], strides = [1, 1]} : vector<16x64xf32> to vector<16x32xf32>
    %122 = vector.extract_strided_slice %120 {offsets = [0, 32], sizes = [16, 32], strides = [1, 1]} : vector<16x64xf32> to vector<16x32xf32>
    %123 = vector.extract_strided_slice %112 {offsets = [0, 64], sizes = [16, 32], strides = [1, 1]} : vector<16x128xf32> to vector<16x32xf32>
    %124 = vector.extract_strided_slice %110 {offsets = [0, 64], sizes = [16, 32], strides = [1, 1]} : vector<16x128xf32> to vector<16x32xf32>
    %125 = arith.mulf %121, %124 : vector<16x32xf32>
    %126 = arith.addf %123, %125 : vector<16x32xf32>
    %127 = math.tanh %126 : vector<16x32xf32>
    %cst_33 = arith.constant 1.000000e+00 : f32
    %128 = vector.broadcast %cst_33 : f32 to vector<16x32xf32>
    %129 = arith.subf %128, %122 : vector<16x32xf32>
    %130 = arith.mulf %129, %127 : vector<16x32xf32>
    %131 = arith.mulf %122, %108 : vector<16x32xf32>
    %132 = arith.addf %130, %131 : vector<16x32xf32>
    %cst_34 = arith.constant dense<0.000000e+00> : vector<16x128xf32>
    %133 = tpu.matmul %132, %32, %cst_34 {dimension_numbers = #tpu.dot_dimension_numbers<[1], [0], [0], [1], [0, 0, 1, 1], [], []>} : vector<16x32xf32>, vector<32x128xf32>, vector<16x128xf32> -> vector<16x128xf32>
    %134 = arith.addf %133, %35 : vector<16x128xf32>
    %135 = vector.extract_strided_slice %31 {offsets = [4, 0, 0], sizes = [1, 16, 128], strides = [1, 1, 1]} : vector<8x16x128xf32> to vector<1x16x128xf32>
    %136 = vector.shape_cast %135 : vector<1x16x128xf32> to vector<16x128xf32>
    %137 = vector.extract_strided_slice %136 {offsets = [0, 0], sizes = [16, 64], strides = [1, 1]} : vector<16x128xf32> to vector<16x64xf32>
    %138 = vector.extract_strided_slice %134 {offsets = [0, 0], sizes = [16, 64], strides = [1, 1]} : vector<16x128xf32> to vector<16x64xf32>
    %139 = arith.addf %137, %138 : vector<16x64xf32>
    %140 = arith.negf %139 : vector<16x64xf32>
    %141 = math.exp %140 : vector<16x64xf32>
    %cst_35 = arith.constant 1.000000e+00 : f32
    %142 = vector.broadcast %cst_35 : f32 to vector<16x64xf32>
    %143 = arith.addf %142, %141 : vector<16x64xf32>
    %144 = arith.divf %142, %143 : vector<16x64xf32>
    %145 = vector.extract_strided_slice %144 {offsets = [0, 0], sizes = [16, 32], strides = [1, 1]} : vector<16x64xf32> to vector<16x32xf32>
    %146 = vector.extract_strided_slice %144 {offsets = [0, 32], sizes = [16, 32], strides = [1, 1]} : vector<16x64xf32> to vector<16x32xf32>
    %147 = vector.extract_strided_slice %136 {offsets = [0, 64], sizes = [16, 32], strides = [1, 1]} : vector<16x128xf32> to vector<16x32xf32>
    %148 = vector.extract_strided_slice %134 {offsets = [0, 64], sizes = [16, 32], strides = [1, 1]} : vector<16x128xf32> to vector<16x32xf32>
    %149 = arith.mulf %145, %148 : vector<16x32xf32>
    %150 = arith.addf %147, %149 : vector<16x32xf32>
    %151 = math.tanh %150 : vector<16x32xf32>
    %cst_36 = arith.constant 1.000000e+00 : f32
    %152 = vector.broadcast %cst_36 : f32 to vector<16x32xf32>
    %153 = arith.subf %152, %146 : vector<16x32xf32>
    %154 = arith.mulf %153, %151 : vector<16x32xf32>
    %155 = arith.mulf %146, %132 : vector<16x32xf32>
    %156 = arith.addf %154, %155 : vector<16x32xf32>
    %cst_37 = arith.constant dense<0.000000e+00> : vector<16x128xf32>
    %157 = tpu.matmul %156, %32, %cst_37 {dimension_numbers = #tpu.dot_dimension_numbers<[1], [0], [0], [1], [0, 0, 1, 1], [], []>} : vector<16x32xf32>, vector<32x128xf32>, vector<16x128xf32> -> vector<16x128xf32>
    %158 = arith.addf %157, %35 : vector<16x128xf32>
    %159 = vector.extract_strided_slice %31 {offsets = [5, 0, 0], sizes = [1, 16, 128], strides = [1, 1, 1]} : vector<8x16x128xf32> to vector<1x16x128xf32>
    %160 = vector.shape_cast %159 : vector<1x16x128xf32> to vector<16x128xf32>
    %161 = vector.extract_strided_slice %160 {offsets = [0, 0], sizes = [16, 64], strides = [1, 1]} : vector<16x128xf32> to vector<16x64xf32>
    %162 = vector.extract_strided_slice %158 {offsets = [0, 0], sizes = [16, 64], strides = [1, 1]} : vector<16x128xf32> to vector<16x64xf32>
    %163 = arith.addf %161, %162 : vector<16x64xf32>
    %164 = arith.negf %163 : vector<16x64xf32>
    %165 = math.exp %164 : vector<16x64xf32>
    %cst_38 = arith.constant 1.000000e+00 : f32
    %166 = vector.broadcast %cst_38 : f32 to vector<16x64xf32>
    %167 = arith.addf %166, %165 : vector<16x64xf32>
    %168 = arith.divf %166, %167 : vector<16x64xf32>
    %169 = vector.extract_strided_slice %168 {offsets = [0, 0], sizes = [16, 32], strides = [1, 1]} : vector<16x64xf32> to vector<16x32xf32>
    %170 = vector.extract_strided_slice %168 {offsets = [0, 32], sizes = [16, 32], strides = [1, 1]} : vector<16x64xf32> to vector<16x32xf32>
    %171 = vector.extract_strided_slice %160 {offsets = [0, 64], sizes = [16, 32], strides = [1, 1]} : vector<16x128xf32> to vector<16x32xf32>
    %172 = vector.extract_strided_slice %158 {offsets = [0, 64], sizes = [16, 32], strides = [1, 1]} : vector<16x128xf32> to vector<16x32xf32>
    %173 = arith.mulf %169, %172 : vector<16x32xf32>
    %174 = arith.addf %171, %173 : vector<16x32xf32>
    %175 = math.tanh %174 : vector<16x32xf32>
    %cst_39 = arith.constant 1.000000e+00 : f32
    %176 = vector.broadcast %cst_39 : f32 to vector<16x32xf32>
    %177 = arith.subf %176, %170 : vector<16x32xf32>
    %178 = arith.mulf %177, %175 : vector<16x32xf32>
    %179 = arith.mulf %170, %156 : vector<16x32xf32>
    %180 = arith.addf %178, %179 : vector<16x32xf32>
    %cst_40 = arith.constant dense<0.000000e+00> : vector<16x128xf32>
    %181 = tpu.matmul %180, %32, %cst_40 {dimension_numbers = #tpu.dot_dimension_numbers<[1], [0], [0], [1], [0, 0, 1, 1], [], []>} : vector<16x32xf32>, vector<32x128xf32>, vector<16x128xf32> -> vector<16x128xf32>
    %182 = arith.addf %181, %35 : vector<16x128xf32>
    %183 = vector.extract_strided_slice %31 {offsets = [6, 0, 0], sizes = [1, 16, 128], strides = [1, 1, 1]} : vector<8x16x128xf32> to vector<1x16x128xf32>
    %184 = vector.shape_cast %183 : vector<1x16x128xf32> to vector<16x128xf32>
    %185 = vector.extract_strided_slice %184 {offsets = [0, 0], sizes = [16, 64], strides = [1, 1]} : vector<16x128xf32> to vector<16x64xf32>
    %186 = vector.extract_strided_slice %182 {offsets = [0, 0], sizes = [16, 64], strides = [1, 1]} : vector<16x128xf32> to vector<16x64xf32>
    %187 = arith.addf %185, %186 : vector<16x64xf32>
    %188 = arith.negf %187 : vector<16x64xf32>
    %189 = math.exp %188 : vector<16x64xf32>
    %cst_41 = arith.constant 1.000000e+00 : f32
    %190 = vector.broadcast %cst_41 : f32 to vector<16x64xf32>
    %191 = arith.addf %190, %189 : vector<16x64xf32>
    %192 = arith.divf %190, %191 : vector<16x64xf32>
    %193 = vector.extract_strided_slice %192 {offsets = [0, 0], sizes = [16, 32], strides = [1, 1]} : vector<16x64xf32> to vector<16x32xf32>
    %194 = vector.extract_strided_slice %192 {offsets = [0, 32], sizes = [16, 32], strides = [1, 1]} : vector<16x64xf32> to vector<16x32xf32>
    %195 = vector.extract_strided_slice %184 {offsets = [0, 64], sizes = [16, 32], strides = [1, 1]} : vector<16x128xf32> to vector<16x32xf32>
    %196 = vector.extract_strided_slice %182 {offsets = [0, 64], sizes = [16, 32], strides = [1, 1]} : vector<16x128xf32> to vector<16x32xf32>
    %197 = arith.mulf %193, %196 : vector<16x32xf32>
    %198 = arith.addf %195, %197 : vector<16x32xf32>
    %199 = math.tanh %198 : vector<16x32xf32>
    %cst_42 = arith.constant 1.000000e+00 : f32
    %200 = vector.broadcast %cst_42 : f32 to vector<16x32xf32>
    %201 = arith.subf %200, %194 : vector<16x32xf32>
    %202 = arith.mulf %201, %199 : vector<16x32xf32>
    %203 = arith.mulf %194, %180 : vector<16x32xf32>
    %204 = arith.addf %202, %203 : vector<16x32xf32>
    %cst_43 = arith.constant dense<0.000000e+00> : vector<16x128xf32>
    %205 = tpu.matmul %204, %32, %cst_43 {dimension_numbers = #tpu.dot_dimension_numbers<[1], [0], [0], [1], [0, 0, 1, 1], [], []>} : vector<16x32xf32>, vector<32x128xf32>, vector<16x128xf32> -> vector<16x128xf32>
    %206 = arith.addf %205, %35 : vector<16x128xf32>
    %207 = vector.extract_strided_slice %31 {offsets = [7, 0, 0], sizes = [1, 16, 128], strides = [1, 1, 1]} : vector<8x16x128xf32> to vector<1x16x128xf32>
    %208 = vector.shape_cast %207 : vector<1x16x128xf32> to vector<16x128xf32>
    %209 = vector.extract_strided_slice %208 {offsets = [0, 0], sizes = [16, 64], strides = [1, 1]} : vector<16x128xf32> to vector<16x64xf32>
    %210 = vector.extract_strided_slice %206 {offsets = [0, 0], sizes = [16, 64], strides = [1, 1]} : vector<16x128xf32> to vector<16x64xf32>
    %211 = arith.addf %209, %210 : vector<16x64xf32>
    %212 = arith.negf %211 : vector<16x64xf32>
    %213 = math.exp %212 : vector<16x64xf32>
    %cst_44 = arith.constant 1.000000e+00 : f32
    %214 = vector.broadcast %cst_44 : f32 to vector<16x64xf32>
    %215 = arith.addf %214, %213 : vector<16x64xf32>
    %216 = arith.divf %214, %215 : vector<16x64xf32>
    %217 = vector.extract_strided_slice %216 {offsets = [0, 0], sizes = [16, 32], strides = [1, 1]} : vector<16x64xf32> to vector<16x32xf32>
    %218 = vector.extract_strided_slice %216 {offsets = [0, 32], sizes = [16, 32], strides = [1, 1]} : vector<16x64xf32> to vector<16x32xf32>
    %219 = vector.extract_strided_slice %208 {offsets = [0, 64], sizes = [16, 32], strides = [1, 1]} : vector<16x128xf32> to vector<16x32xf32>
    %220 = vector.extract_strided_slice %206 {offsets = [0, 64], sizes = [16, 32], strides = [1, 1]} : vector<16x128xf32> to vector<16x32xf32>
    %221 = arith.mulf %217, %220 : vector<16x32xf32>
    %222 = arith.addf %219, %221 : vector<16x32xf32>
    %223 = math.tanh %222 : vector<16x32xf32>
    %cst_45 = arith.constant 1.000000e+00 : f32
    %224 = vector.broadcast %cst_45 : f32 to vector<16x32xf32>
    %225 = arith.subf %224, %218 : vector<16x32xf32>
    %226 = arith.mulf %225, %223 : vector<16x32xf32>
    %227 = arith.mulf %218, %204 : vector<16x32xf32>
    %228 = arith.addf %226, %227 : vector<16x32xf32>
    %c0_46 = arith.constant 0 : index
    %c0_47 = arith.constant 0 : index
    %229 = vector.load %arg7[%c0_46, %c0_47] : memref<32x4xf32, #tpu.memory_space<vmem>>, vector<32x4xf32>
    %cst_48 = arith.constant dense<0.000000e+00> : vector<16x4xf32>
    %230 = tpu.matmul %228, %229, %cst_48 {dimension_numbers = #tpu.dot_dimension_numbers<[1], [0], [0], [1], [0, 0, 1, 1], [], []>} : vector<16x32xf32>, vector<32x4xf32>, vector<16x4xf32> -> vector<16x4xf32>
    %c0_49 = arith.constant 0 : index
    %c0_50 = arith.constant 0 : index
    %231 = vector.load %arg8[%c0_49, %c0_50] : memref<1x4xf32, #tpu.memory_space<vmem>>, vector<1x4xf32>
    %232 = vector.broadcast %231 : vector<1x4xf32> to vector<16x4xf32>
    %233 = arith.addf %230, %232 : vector<16x4xf32>
    %cst_51 = arith.constant dense<0xFF800000> : vector<16xf32>
    %234 = vector.multi_reduction <maximumf>, %233, %cst_51 [1] : vector<16x4xf32> to vector<16xf32>
    %235 = vector.shape_cast %234 : vector<16xf32> to vector<16x1xf32>
    %236 = vector.broadcast %235 : vector<16x1xf32> to vector<16x4xf32>
    %237 = arith.subf %233, %236 : vector<16x4xf32>
    %238 = math.exp %237 : vector<16x4xf32>
    %cst_52 = arith.constant dense<0.000000e+00> : vector<16xf32>
    %239 = vector.multi_reduction <add>, %238, %cst_52 [1] : vector<16x4xf32> to vector<16xf32>
    %240 = vector.shape_cast %239 : vector<16xf32> to vector<16x1xf32>
    %241 = vector.broadcast %240 : vector<16x1xf32> to vector<16x4xf32>
    %242 = arith.divf %238, %241 : vector<16x4xf32>
    %243 = vector.extract_strided_slice %242 {offsets = [0, 0], sizes = [16, 1], strides = [1, 1]} : vector<16x4xf32> to vector<16x1xf32>
    %244 = vector.extract_strided_slice %242 {offsets = [0, 1], sizes = [16, 1], strides = [1, 1]} : vector<16x4xf32> to vector<16x1xf32>
    %245 = arith.addf %243, %244 : vector<16x1xf32>
    %246 = vector.extract_strided_slice %242 {offsets = [0, 2], sizes = [16, 1], strides = [1, 1]} : vector<16x4xf32> to vector<16x1xf32>
    %247 = arith.addf %245, %246 : vector<16x1xf32>
    %248 = vector.extract_strided_slice %242 {offsets = [0, 3], sizes = [16, 1], strides = [1, 1]} : vector<16x4xf32> to vector<16x1xf32>
    %249 = arith.addf %247, %248 : vector<16x1xf32>
    %250 = tpu.concatenate %243, %245, %247, %249 in 1 : vector<16x1xf32>, vector<16x1xf32>, vector<16x1xf32>, vector<16x1xf32> -> vector<16x4xf32>
    %cst_53 = arith.constant 5.000000e-08 : f32
    %cst_54 = arith.constant 0.99999994 : f32
    %251 = vector.broadcast %cst_53 : f32 to vector<16x4xf32>
    %252 = arith.maximumf %251, %250 : vector<16x4xf32>
    %253 = vector.broadcast %cst_54 : f32 to vector<16x4xf32>
    %254 = arith.minimumf %253, %252 : vector<16x4xf32>
    %c0_55 = arith.constant 0 : index
    %c0_56 = arith.constant 0 : index
    %255 = vector.load %arg9[%c0_55, %c0_56] : memref<16x4xf32, #tpu.memory_space<vmem>>, vector<16x4xf32>
    tpu.vector_store %arg9[%c0_55, %c0_56], %254 {strides = array<i32>} : memref<16x4xf32, #tpu.memory_space<vmem>>, vector<16x4xf32>,
    return
  }
}

</mosaic_0001>

<bundles_post_ra>
// kernel: neudp_forward.1
= control target key start
LH: loop header
LB: loop body
LE: loop exit
PB: predicated region body
PF: predicated region fallthrough
CT: control target
= control target key end

     0   :  { %vm474_vm0 = vcmask 1043456   ;;  %vm48_vm1 = vcmask 31744   ;;  %v2378_v3 = vmov 0.0   ;;  %s2379_s27 = smov 64   ;;  %s2380_s30 = smov 96   ;;  %vm634_vm2 = vcmask 261120   ;;  %s2904_s5 = inlined_call_operand.vmem [shape: f32[32,128], index: 5, kind: input, shape index: {}]   ;;  %s2905_s3 = inlined_call_operand.vmem [shape: f32[4,128], index: 3, kind: input, shape index: {}]   ;;  %s2906_s0 = inlined_call_operand.vmem [shape: f32[8,16,4], index: 0, kind: input, shape index: {}]   ;;  %s2907_s1 = inlined_call_operand.vmem [shape: f32[8,1,4], index: 1, kind: input, shape index: {}]   ;;  %s2908_s2 = inlined_call_operand.vmem [shape: f32[8,1,4], index: 2, kind: input, shape index: {}]   ;;  %s2909_s6 = inlined_call_operand.vmem [shape: f32[1,128], index: 6, kind: input, shape index: {}]   ;;  %s2910_s4 = inlined_call_operand.vmem [shape: f32[1,128], index: 4, kind: input, shape index: {}]   ;;  %s2911_s7 = inlined_call_operand.vmem [shape: f32[32,4], index: 7, kind: input, shape index: {}]   ;;  %s2912_s8 = inlined_call_operand.vmem [shape: f32[1,4], index: 8, kind: input, shape index: {}]   ;;  %s2913_s9 = inlined_call_operand.vmem [shape: f32[16,4], index: 9, kind: output, shape index: {}]  }
   0x1   :  { %v623_v0 = vld [vmem:[%s2904_s5] sm:$0xff]  ;;  %v624_v1 = vld [vmem:[%s2904_s5 + $0x8] sm:$0xff]  ;;  %v625_v2 = vld [vmem:[%s2904_s5 + $0x10] sm:$0xff]  ;;  %2084 = vmatprep.mubr.f32.mxu1 %v2378_v3  ;;  %s2383_s29 = smov 125   ;;  %s2384_s10 = smov 1   ;;  %vm1892_vm3 = vcmask 7168  }
   0x2   :  { %v2446_v4 = vpack.c.bf16 %v624_v1, %v623_v0  ;;  %v626_v5 = vld [vmem:[%s2904_s5 + $0x18] sm:$0xff]  ;;  %v418_v6 = vld [vmem:[%s2905_s3] sm:$0xf]  ;;  %v33_v9 = vld [vmem:[%s2906_s0 + $0x8] sm:$0xff]  ;;  %s2385_s11 = smov 2   ;;  %s2386_s12 = smov 3  }
   0x3   :  { %v32_v7 = vld [vmem:[%s2906_s0] sm:$0xff]  ;;  %v2457_v8 = vpack.c.bf16 %v626_v5, %v625_v2  ;;  %2050 = vmatprep.subr.msk.mxu0 %vm474_vm0, %v418_v6  ;;  %v50_v11 = vsel %vm48_vm1, %v33_v9, 0.0  ;;  %vm1895_vm4 = vcmask 15360   ;;  %vm1898_vm5 = vcmask 23552  }
   0x4   :  { %v49_v10 = vsel %vm48_vm1, %v32_v7, 0.0  ;;  %2176 = vmatprep.subr.bf16.mxu1 %v2446_v4  ;;  %2051 = vmatpush3.msk.msra.mxu0 %vm474_vm0, %v418_v6  ;;  %v1911_v36 = vld [vmem:[%s2907_s1] ss:$0 sm:$0xff] }
   0x5   :  { %2178 = vmatpush3.bf16.msra.mxu1 %v2446_v4  ;;  %v51_v12 = vadd.f32 %v50_v11, %v49_v10  ;;  %2208 = vmatprep.subr.bf16.mxu0 %v2446_v4  ;;  %v1919_v39 = vld [vmem:[%s2908_s2] ss:$0 sm:$0xff] }
   0x6   :  { %2180 = vmatprep.subr.bf16.mxu1 %v2457_v8  ;;  %v2493_v44 = vld [vmem:[%s2909_s6] ss:$0 sm:$0xff] }
   0x7   :  { %v52_v13 = vrot.slane %v51_v12, 4  ;;  %v2502_v51 = vld [vmem:[%s2910_s4] ss:$0 sm:$0xff] }
   0x9   :  { %2182 = vmatpush3.bf16.msra.mxu1 %v2457_v8  ;;  %v53_v14 = vadd.f32 %v52_v13, %v51_v12  ;;  %v34_v12 = vld [vmem:[%s2906_s0 + $0x10] sm:$0xff]  ;;  %v35_v13 = vld [vmem:[%s2906_s0 + $0x18] sm:$0xff] }
   0xa   :  { %2184 = vmatprep.subr.bf16.mxu1 %v2446_v4 }
   0xb   :  { %v54_v15 = vrot.slane %v53_v14, 2 }
   0xc   :  { %2085 = vmatmul.mubr.f32.vlgmr.msra.gmra.mrb[0].mxu1 %v2378_v3 }
   0xd   :  { %v55_v16 = vadd.f32 %v54_v15, %v53_v14  ;;  %2186 = vmatpush3.bf16.msra.mxu1 %v2446_v4  ;;  %v58_v14 = vsel %vm48_vm1, %v34_v12, 0.0  ;;  %v59_v15 = vsel %vm48_vm1, %v35_v13, 0.0 }
   0xe   :  { %2188 = vmatprep.subr.bf16.mxu1 %v2457_v8 }
   0xf   :  { %v56_v17 = vrot.slane %v55_v16, 1 }
  0x11   :  { %v57_v18 = vadd.f32 %v56_v17, %v55_v16  ;;  %2190 = vmatpush3.bf16.msra.mxu1 %v2457_v8  ;;  %v60_v16 = vadd.f32 %v59_v15, %v58_v14 }
  0x12   :  { %2192 = vmatprep.subr.bf16.mxu1 %v2446_v4 }
  0x13   :  { %v122_v19 = vmul.f32 0.0625, %v57_v18  ;;  %v61_v17 = vrot.slane %v60_v16, 4 }
  0x15   :  { %v130_v20 = vsub.f32 %v32_v7, %v122_v19  ;;  %v131_v21 = vsub.f32 %v33_v9, %v122_v19  ;;  %v62_v18 = vadd.f32 %v61_v17, %v60_v16 }
  0x17   :  { %v146_v22 = vmul.f32 %v130_v20, %v130_v20  ;;  %v147_v23 = vmul.f32 %v131_v21, %v131_v21  ;;  %v63_v19 = vrot.slane %v62_v18, 2 }
  0x19   :  { %v162_v24 = vsel %vm48_vm1, %v146_v22, 0.0  ;;  %v163_v25 = vsel %vm48_vm1, %v147_v23, 0.0 }
  0x1a   :  { %v164_v26 = vadd.f32 %v163_v25, %v162_v24 }
  0x1c   :  { %v165_v27 = vrot.slane %v164_v26, 4 }
  0x1e   :  { %v166_v28 = vadd.f32 %v165_v27, %v164_v26 }
  0x20   :  { %v167_v29 = vrot.slane %v166_v28, 2 }
  0x22   :  { %v168_v30 = vadd.f32 %v167_v29, %v166_v28 }
  0x24   :  { %v169_v31 = vrot.slane %v168_v30, 1 }
  0x26   :  { %v170_v32 = vadd.f32 %v169_v31, %v168_v30 }
  0x28   :  { %v234_v33 = vmul.f32 0.0625, %v170_v32 }
  0x2a   :  { %v242_v34 = vadd.f32 1e-05, %v234_v33 }
  0x2c   :  { %2256 = vrsqrt.f32 %v242_v34 }
  0x36   :  { %v2257_v35 = vpop.eup %2256 }
  0x37   :  { %v258_v37 = vmul.f32 %v2257_v35, %v130_v20  ;;  %v259_v38 = vmul.f32 %v2257_v35, %v131_v21  ;;  %v64_v20 = vadd.f32 %v63_v19, %v62_v18 }
  0x39   :  { %v330_v40 = vmul.f32 %v1911_v36, %v258_v37  ;;  %v331_v41 = vmul.f32 %v1911_v36, %v259_v38  ;;  %v65_v21 = vrot.slane %v64_v20, 1 }
  0x3b   :  { %v402_v42 = vadd.f32 %v1919_v39, %v330_v40  ;;  %v403_v43 = vadd.f32 %v1919_v39, %v331_v41  ;;  %v66_v22 = vadd.f32 %v65_v21, %v64_v20  ;;  %v1912_v41 = vld [vmem:[%s2907_s1 + $0x1] ss:$0 sm:$0xff] }
  0x3d   :  { %2052 = vmatprep.mubr.msk.f32.mxu0 %vm48_vm1, %v402_v42  ;;  %v123_v23 = vmul.f32 0.0625, %v66_v22  ;;  %v1920_v42 = vld [vmem:[%s2908_s2 + $0x1] ss:$0 sm:$0xff] }
  0x3e   :  { %2053 = vmatmul.mubr.msk.f32.vlgmr.msra.gmra.mrb[0].mxu0 %vm48_vm1, %v403_v43 }
  0x3f   :  { %2210 = vmatpush3.bf16.msra.mxu0 %v2446_v4  ;;  %v132_v24 = vsub.f32 %v34_v12, %v123_v23  ;;  %v133_v25 = vsub.f32 %v35_v13, %v123_v23 }
  0x40   :  { %2212 = vmatprep.subr.bf16.mxu0 %v2457_v8 }
  0x41   :  { %v148_v26 = vmul.f32 %v132_v24, %v132_v24  ;;  %v149_v27 = vmul.f32 %v133_v25, %v133_v25 }
  0x43   :  { %2214 = vmatpush3.bf16.msra.mxu0 %v2457_v8  ;;  %v171_v28 = vsel %vm48_vm1, %v148_v26, 0.0  ;;  %v172_v29 = vsel %vm48_vm1, %v149_v27, 0.0 }
  0x44   :  { %2224 = vmatprep.subr.bf16.mxu0 %v2446_v4  ;;  %v173_v30 = vadd.f32 %v172_v29, %v171_v28  ;;  %v36_v28 = vld [vmem:[%s2906_s0 + $0x20] sm:$0xff]  ;;  %v37_v29 = vld [vmem:[%s2906_s0 + $0x28] sm:$0xff] }
  0x46   :  { %v174_v31 = vrot.slane %v173_v30, 4 }
  0x48   :  { %v175_v32 = vadd.f32 %v174_v31, %v173_v30  ;;  %v67_v30 = vsel %vm48_vm1, %v36_v28, 0.0  ;;  %v68_v31 = vsel %vm48_vm1, %v37_v29, 0.0 }
  0x4a   :  { %v176_v33 = vrot.slane %v175_v32, 2 }
  0x4c   :  { %v177_v34 = vadd.f32 %v176_v33, %v175_v32  ;;  %v69_v32 = vadd.f32 %v68_v31, %v67_v30 }
  0x4e   :  { %v178_v35 = vrot.slane %v177_v34, 1  ;;  %v70_v33 = vrot.slane %v69_v32, 4 }
  0x50   :  { %v179_v36 = vadd.f32 %v178_v35, %v177_v34  ;;  %v71_v34 = vadd.f32 %v70_v33, %v69_v32 }
  0x52   :  { %v235_v37 = vmul.f32 0.0625, %v179_v36  ;;  %v72_v35 = vrot.slane %v71_v34, 2 }
  0x54   :  { %v243_v38 = vadd.f32 1e-05, %v235_v37  ;;  %v73_v36 = vadd.f32 %v72_v35, %v71_v34 }
  0x56   :  { %v74_v37 = vrot.slane %v73_v36, 1 }
  0xdf   :  { %v2086_v45 = vpop.f32.mrb[0].mxu1 }
  0xe0   :  { %v704_v46 = vpop.f32.mrb[1].mxu1  ;;  %v710_v48 = vadd.f32 %v2086_v45, %v2493_v44 }
  0xe1   :  { %v705_v47 = vadd.f32 %v2493_v44, %v704_v46 }
  0xe3   :  { %729 = vrot.lane.b32.xlu0 %v705_v47, %s2379_s27 }
  0xe7   :  { %731 = vrot.lane.b32.xlu0 %v710_v48, %s2379_s27 }
 0x111   :  { %v2054_v49 = vpop.f32.mrb[0].mxu0 }
 0x112   :  { %v544_v50 = vpop.f32.mrb[1].mxu0  ;;  %v550_v53 = vadd.f32 %v2054_v49, %v2502_v51 }
 0x113   :  { %v545_v52 = vadd.f32 %v2502_v51, %v544_v50 }
 0x114   :  { %v714_v55 = vadd.f32 %v710_v48, %v550_v53 }
 0x115   :  { %v713_v54 = vadd.f32 %v705_v47, %v545_v52 }
 0x116   :  { %v1947_v57 = vmul.f32 -1.442695, %v714_v55 }
 0x117   :  { %v1946_v56 = vmul.f32 -1.442695, %v713_v54 }
 0x119   :  { %2258 = vpow2.f32 %v1946_v56 }
 0x11a   :  { %2260 = vpow2.f32 %v1947_v57 }
 0x123   :  { %v2259_v58 = vpop.eup %2258 }
 0x124   :  { %v721_v59 = vadd.f32 1.0, %v2259_v58  ;;  %v2261_v60 = vpop.eup %2260 }
 0x125   :  { %v722_v61 = vadd.f32 1.0, %v2261_v60 }
 0x126   :  { %2262 = vrcp.f32 %v721_v59 }
 0x127   :  { %2264 = vrcp.f32 %v722_v61 }
 0x130   :  { %v2263_v62 = vpop.eup %2262 }
 0x131   :  { %v2507_v1 = vpop.eup %2264  ;;  %v749_v49 = vsub.f32 1.0, %v2263_v62 }
 0x132   :  { %v750_v55 = vsub.f32 1.0, %v2507_v1  ;;  %v762_v57 = vmul.f32 0.0, %v2507_v1 }
 0x155   :  { %v730_v63 = vpop.permute.xlu0 %729 }
 0x156   :  { %v735_v0 = vmul.f32 %v2263_v62, %v730_v63 }
 0x158   :  { %739 = vrot.lane.b32.xlu1 %v735_v0, %s2379_s27 }
 0x159   :  { %v732_v2 = vpop.permute.xlu0 %731 }
 0x15a   :  { %v736_v3 = vmul.f32 %v2507_v1, %v732_v2 }
 0x15c   :  { %741 = vrot.lane.b32.xlu1 %v736_v3, %s2379_s27 }
 0x1ca   :  { %v740_v5 = vpop.permute.xlu1 %739 }
 0x1cb   :  { %v745_v6 = vadd.f32 %v740_v5, %v545_v52  ;;  %v761_v52 = vmul.f32 0.0, %v2263_v62 }
 0x1cd   :  { %2266 = vtanh.f32 %v745_v6 }
 0x1ce   :  { %v742_v7 = vpop.permute.xlu1 %741 }
 0x1cf   :  { %v746_v9 = vadd.f32 %v742_v7, %v550_v53 }
 0x1d1   :  { %2268 = vtanh.f32 %v746_v9 }
 0x1d2   :  { %2270 = vrsqrt.f32 %v243_v38  ;;  %v75_v38 = vadd.f32 %v74_v37, %v73_v36 }
 0x1d7   :  { %v2267_v10 = vpop.eup %2266 }
 0x1d8   :  { %753 = vrot.lane.b32.xlu0 %v2267_v10, %s2380_s30 }
 0x1db   :  { %v2269_v11 = vpop.eup %2268 }
 0x1dc   :  { %755 = vrot.lane.b32.xlu1 %v2269_v11, %s2380_s30  ;;  %v2271_v39 = vpop.eup %2270 }
 0x1dd   :  { %v260_v40 = vmul.f32 %v2271_v39, %v132_v24  ;;  %v261_v43 = vmul.f32 %v2271_v39, %v133_v25  ;;  %v124_v39 = vmul.f32 0.0625, %v75_v38 }
 0x1df   :  { %v332_v45 = vmul.f32 %v1912_v41, %v260_v40  ;;  %v333_v46 = vmul.f32 %v1912_v41, %v261_v43  ;;  %v134_v40 = vsub.f32 %v36_v28, %v124_v39  ;;  %v135_v41 = vsub.f32 %v37_v29, %v124_v39 }
 0x1e1   :  { %v404_v47 = vadd.f32 %v1920_v42, %v332_v45  ;;  %v405_v48 = vadd.f32 %v1920_v42, %v333_v46  ;;  %v150_v42 = vmul.f32 %v134_v40, %v134_v40  ;;  %v151_v43 = vmul.f32 %v135_v41, %v135_v41 }
 0x1e3   :  { %2055 = vmatprep.mubr.msk.f32.mxu0 %vm48_vm1, %v404_v47  ;;  %v180_v45 = vsel %vm48_vm1, %v150_v42, 0.0  ;;  %v181_v46 = vsel %vm48_vm1, %v151_v43, 0.0 }
 0x1e4   :  { %2056 = vmatmul.mubr.msk.f32.gmra.mrb[2].mxu0 %vm48_vm1, %v405_v48  ;;  %v182_v47 = vadd.f32 %v181_v46, %v180_v45  ;;  %v38_v45 = vld [vmem:[%s2906_s0 + $0x30] sm:$0xff]  ;;  %v39_v46 = vld [vmem:[%s2906_s0 + $0x38] sm:$0xff] }
 0x1e6   :  { %v183_v48 = vrot.slane %v182_v47, 4 }
 0x24a   :  { %v754_v50 = vpop.permute.xlu0 %753 }
 0x24b   :  { %v759_v53 = vmul.f32 %v754_v50, %v749_v49  ;;  %v184_v49 = vadd.f32 %v183_v48, %v182_v47  ;;  %v76_v47 = vsel %vm48_vm1, %v38_v45, 0.0  ;;  %v77_v48 = vsel %vm48_vm1, %v39_v46, 0.0 }
 0x24d   :  { %v2531_v54 = vadd.f32 %v761_v52, %v759_v53  ;;  %v185_v50 = vrot.slane %v184_v49, 2 }
 0x24e   :  { %v756_v56 = vpop.permute.xlu1 %755 }
 0x24f   :  { %v760_v58 = vmul.f32 %v756_v56, %v750_v55  ;;  %767 = vrot.lane.b32.xlu0 %v2531_v54, %s2380_s30  ;;  %v186_v52 = vadd.f32 %v185_v50, %v184_v49  ;;  %v78_v49 = vadd.f32 %v77_v48, %v76_v47 }
 0x251   :  { %v2537_v59 = vadd.f32 %v762_v57, %v760_v58  ;;  %v187_v53 = vrot.slane %v186_v52, 1  ;;  %v79_v50 = vrot.slane %v78_v49, 4 }
 0x253   :  { %769 = vrot.lane.b32.xlu1 %v2537_v59, %s2380_s30  ;;  %v188_v55 = vadd.f32 %v187_v53, %v186_v52  ;;  %v80_v52 = vadd.f32 %v79_v50, %v78_v49 }
 0x255   :  { %v236_v56 = vmul.f32 0.0625, %v188_v55  ;;  %v81_v53 = vrot.slane %v80_v52, 2 }
 0x257   :  { %v244_v57 = vadd.f32 1e-05, %v236_v56  ;;  %v82_v55 = vadd.f32 %v81_v53, %v80_v52 }
 0x259   :  { %v83_v56 = vrot.slane %v82_v55, 1 }
 0x2b7   :  { %v2057_v62 = vpop.f32.mrb[2].mxu0 }
 0x2b8   :  { %v554_v63 = vpop.f32.mrb[3].mxu0  ;;  %v560_v5 = vadd.f32 %v2057_v62, %v2502_v51 }
 0x2b9   :  { %v555_v6 = vadd.f32 %v2502_v51, %v554_v63 }
 0x2c1   :  { %v768_v60 = vpop.permute.xlu0 %767 }
 0x2c2   :  { %2095 = vmatprep.mubr.msk.f32.mxu1 %vm634_vm2, %v768_v60 }
 0x2c5   :  { %v770_v61 = vpop.permute.xlu1 %769 }
 0x2c6   :  { %2096 = vmatmul.mubr.msk.f32.vlgmr.msra.gmra.mrb[2].mxu1 %vm634_vm2, %v770_v61  ;;  %v1913_v61 = vld [vmem:[%s2907_s1 + $0x2] ss:$0 sm:$0xff] }
 0x2c7   :  { %2194 = vmatpush3.bf16.msra.mxu1 %v2446_v4 }
 0x2c8   :  { %2196 = vmatprep.subr.bf16.mxu1 %v2457_v8 }
 0x2cb   :  { %2198 = vmatpush3.bf16.msra.mxu1 %v2457_v8 }
 0x2cc   :  { %2200 = vmatprep.subr.bf16.mxu1 %v2446_v4 }
 0x399   :  { %v2097_v0 = vpop.f32.mrb[2].mxu1 }
 0x39a   :  { %v847_v1 = vadd.f32 %v2097_v0, %v2493_v44  ;;  %v841_v2 = vpop.f32.mrb[3].mxu1  ;;  %v1921_v0 = vld [vmem:[%s2908_s2 + $0x2] ss:$0 sm:$0xff] }
 0x39b   :  { %v842_v3 = vadd.f32 %v2493_v44, %v841_v2 }
 0x39c   :  { %868 = vrot.lane.b32.xlu1 %v847_v1, %s2379_s27  ;;  %v851_v7 = vadd.f32 %v847_v1, %v560_v5 }
 0x39d   :  { %866 = vrot.lane.b32.xlu0 %v842_v3, %s2379_s27  ;;  %v850_v9 = vadd.f32 %v842_v3, %v555_v6 }
 0x39e   :  { %v1951_v10 = vmul.f32 -1.442695, %v851_v7 }
 0x39f   :  { %v1950_v11 = vmul.f32 -1.442695, %v850_v9 }
 0x3a0   :  { %2272 = vpow2.f32 %v1951_v10 }
 0x3a1   :  { %2274 = vpow2.f32 %v1950_v11 }
 0x3aa   :  { %v2273_v12 = vpop.eup %2272 }
 0x3ab   :  { %v2275_v13 = vpop.eup %2274  ;;  %v859_v14 = vadd.f32 1.0, %v2273_v12 }
 0x3ac   :  { %v858_v15 = vadd.f32 1.0, %v2275_v13 }
 0x3ad   :  { %2276 = vrcp.f32 %v859_v14 }
 0x3ae   :  { %2278 = vrcp.f32 %v858_v15 }
 0x3b7   :  { %v2277_v16 = vpop.eup %2276 }
 0x3b8   :  { %v2553_v18 = vpop.eup %2278  ;;  %v899_v9 = vmul.f32 %v2277_v16, %v2537_v59 }
 0x3b9   :  { %v886_v7 = vsub.f32 1.0, %v2553_v18  ;;  %v898_v12 = vmul.f32 %v2553_v18, %v2531_v54 }
 0x40e   :  { %v869_v17 = vpop.permute.xlu1 %868 }
 0x40f   :  { %v873_v19 = vmul.f32 %v2277_v16, %v869_v17  ;;  %v867_v20 = vpop.permute.xlu0 %866 }
 0x410   :  { %v872_v21 = vmul.f32 %v2553_v18, %v867_v20 }
 0x411   :  { %878 = vrot.lane.b32.xlu1 %v873_v19, %s2379_s27 }
 0x412   :  { %876 = vrot.lane.b32.xlu0 %v872_v21, %s2379_s27 }
 0x483   :  { %v879_v22 = vpop.permute.xlu1 %878 }
 0x484   :  { %v883_v23 = vadd.f32 %v879_v22, %v560_v5  ;;  %v877_v24 = vpop.permute.xlu0 %876  ;;  %v887_v5 = vsub.f32 1.0, %v2277_v16 }
 0x485   :  { %v882_v25 = vadd.f32 %v877_v24, %v555_v6 }
 0x486   :  { %2280 = vtanh.f32 %v883_v23 }
 0x487   :  { %2282 = vtanh.f32 %v882_v25 }
 0x488   :  { %2284 = vrsqrt.f32 %v244_v57  ;;  %v84_v57 = vadd.f32 %v83_v56, %v82_v55 }
 0x490   :  { %v2281_v26 = vpop.eup %2280 }
 0x491   :  { %v2283_v27 = vpop.eup %2282  ;;  %892 = vrot.lane.b32.xlu1 %v2281_v26, %s2380_s30 }
 0x492   :  { %890 = vrot.lane.b32.xlu0 %v2283_v27, %s2380_s30  ;;  %v2285_v58 = vpop.eup %2284 }
 0x493   :  { %v262_v60 = vmul.f32 %v2285_v58, %v134_v40  ;;  %v263_v62 = vmul.f32 %v2285_v58, %v135_v41  ;;  %v125_v58 = vmul.f32 0.0625, %v84_v57 }
 0x495   :  { %v334_v63 = vmul.f32 %v1913_v61, %v262_v60  ;;  %v335_v1 = vmul.f32 %v1913_v61, %v263_v62  ;;  %v136_v60 = vsub.f32 %v38_v45, %v125_v58  ;;  %v137_v61 = vsub.f32 %v39_v46, %v125_v58 }
 0x497   :  { %v406_v2 = vadd.f32 %v1921_v0, %v334_v63  ;;  %v407_v3 = vadd.f32 %v1921_v0, %v335_v1  ;;  %v152_v62 = vmul.f32 %v136_v60, %v136_v60  ;;  %v153_v63 = vmul.f32 %v137_v61, %v137_v61 }
 0x499   :  { %2058 = vmatprep.mubr.msk.f32.mxu0 %vm48_vm1, %v406_v2  ;;  %v189_v0 = vsel %vm48_vm1, %v152_v62, 0.0  ;;  %v190_v1 = vsel %vm48_vm1, %v153_v63, 0.0 }
 0x49a   :  { %2059 = vmatmul.mubr.msk.f32.gmra.mrb[4].mxu0 %vm48_vm1, %v407_v3  ;;  %v191_v2 = vadd.f32 %v190_v1, %v189_v0  ;;  %v42_v0 = vld [vmem:[%s2906_s0 + $0x50] sm:$0xff]  ;;  %v43_v1 = vld [vmem:[%s2906_s0 + $0x58] sm:$0xff] }
 0x49c   :  { %v192_v3 = vrot.slane %v191_v2, 4 }
 0x503   :  { %v893_v6 = vpop.permute.xlu1 %892 }
 0x504   :  { %v897_v10 = vmul.f32 %v893_v6, %v887_v5  ;;  %v891_v11 = vpop.permute.xlu0 %890  ;;  %v193_v5 = vadd.f32 %v192_v3, %v191_v2  ;;  %v94_v3 = vsel %vm48_vm1, %v42_v0, 0.0 }
 0x505   :  { %v896_v13 = vmul.f32 %v891_v11, %v886_v7 }
 0x506   :  { %v2582_v14 = vadd.f32 %v899_v9, %v897_v10  ;;  %v194_v6 = vrot.slane %v193_v5, 2 }
 0x507   :  { %v2584_v15 = vadd.f32 %v898_v12, %v896_v13 }
 0x508   :  { %906 = vrot.lane.b32.xlu1 %v2582_v14, %s2380_s30  ;;  %v195_v7 = vadd.f32 %v194_v6, %v193_v5  ;;  %v95_v5 = vsel %vm48_vm1, %v43_v1, 0.0 }
 0x509   :  { %904 = vrot.lane.b32.xlu0 %v2584_v15, %s2380_s30  ;;  %v96_v6 = vadd.f32 %v95_v5, %v94_v3 }
 0x50a   :  { %v196_v9 = vrot.slane %v195_v7, 1 }
 0x50c   :  { %v197_v10 = vadd.f32 %v196_v9, %v195_v7  ;;  %v44_v7 = vld [vmem:[%s2906_s0 + $0x60] sm:$0xff]  ;;  %v45_v9 = vld [vmem:[%s2906_s0 + $0x68] sm:$0xff] }
 0x50e   :  { %v237_v11 = vmul.f32 0.0625, %v197_v10 }
 0x510   :  { %v245_v12 = vadd.f32 1e-05, %v237_v11  ;;  %v103_v11 = vsel %vm48_vm1, %v44_v7, 0.0 }
 0x56d   :  { %v2060_v54 = vpop.f32.mrb[4].mxu0 }
 0x56e   :  { %v564_v59 = vpop.f32.mrb[5].mxu0  ;;  %v570_v22 = vadd.f32 %v2060_v54, %v2502_v51 }
 0x56f   :  { %v565_v23 = vadd.f32 %v2502_v51, %v564_v59 }
 0x57a   :  { %v907_v19 = vpop.permute.xlu1 %906 }
 0x57b   :  { %v905_v17 = vpop.permute.xlu0 %904 }
 0x57c   :  { %2106 = vmatprep.mubr.msk.f32.mxu1 %vm634_vm2, %v905_v17 }
 0x57d   :  { %2107 = vmatmul.mubr.msk.f32.vlgmr.msra.gmra.mrb[4].mxu1 %vm634_vm2, %v907_v19  ;;  %v1914_v19 = vld [vmem:[%s2907_s1 + $0x3] ss:$0 sm:$0xff] }
 0x57e   :  { %2202 = vmatpush3.bf16.msra.mxu1 %v2446_v4 }
 0x57f   :  { %2204 = vmatprep.subr.bf16.mxu1 %v2457_v8 }
 0x582   :  { %2206 = vmatpush3.bf16.msra.mxu1 %v2457_v8 }
 0x583   :  { %2216 = vmatprep.subr.bf16.mxu1 %v2446_v4 }
 0x650   :  { %v2108_v16 = vpop.f32.mrb[4].mxu1 }
 0x651   :  { %v984_v18 = vadd.f32 %v2108_v16, %v2493_v44  ;;  %v978_v20 = vpop.f32.mrb[5].mxu1  ;;  %v1922_v16 = vld [vmem:[%s2908_s2 + $0x3] ss:$0 sm:$0xff] }
 0x652   :  { %v979_v21 = vadd.f32 %v2493_v44, %v978_v20 }
 0x653   :  { %1005 = vrot.lane.b32.xlu1 %v984_v18, %s2379_s27  ;;  %v988_v24 = vadd.f32 %v984_v18, %v570_v22 }
 0x654   :  { %1003 = vrot.lane.b32.xlu0 %v979_v21, %s2379_s27  ;;  %v987_v25 = vadd.f32 %v979_v21, %v565_v23 }
 0x655   :  { %v1955_v26 = vmul.f32 -1.442695, %v988_v24 }
 0x656   :  { %v1954_v27 = vmul.f32 -1.442695, %v987_v25 }
 0x657   :  { %2286 = vpow2.f32 %v1955_v26 }
 0x658   :  { %2288 = vpow2.f32 %v1954_v27 }
 0x661   :  { %v2287_v28 = vpop.eup %2286 }
 0x662   :  { %v2289_v29 = vpop.eup %2288  ;;  %v996_v30 = vadd.f32 1.0, %v2287_v28 }
 0x663   :  { %v995_v31 = vadd.f32 1.0, %v2289_v29 }
 0x664   :  { %2290 = vrcp.f32 %v996_v30 }
 0x665   :  { %2292 = vrcp.f32 %v995_v31 }
 0x66e   :  { %v2291_v32 = vpop.eup %2290 }
 0x66f   :  { %v2602_v34 = vpop.eup %2292  ;;  %v1036_v25 = vmul.f32 %v2291_v32, %v2582_v14 }
 0x670   :  { %v1023_v24 = vsub.f32 1.0, %v2602_v34  ;;  %v1035_v28 = vmul.f32 %v2602_v34, %v2584_v15 }
 0x6c5   :  { %v1006_v33 = vpop.permute.xlu1 %1005 }
 0x6c6   :  { %v1010_v35 = vmul.f32 %v2291_v32, %v1006_v33  ;;  %v1004_v36 = vpop.permute.xlu0 %1003 }
 0x6c7   :  { %v1009_v37 = vmul.f32 %v2602_v34, %v1004_v36 }
 0x6c8   :  { %1015 = vrot.lane.b32.xlu1 %v1010_v35, %s2379_s27 }
 0x6c9   :  { %1013 = vrot.lane.b32.xlu0 %v1009_v37, %s2379_s27 }
 0x73a   :  { %v1016_v38 = vpop.permute.xlu1 %1015 }
 0x73b   :  { %v1020_v39 = vadd.f32 %v1016_v38, %v570_v22  ;;  %v1014_v40 = vpop.permute.xlu0 %1013  ;;  %v1024_v22 = vsub.f32 1.0, %v2291_v32 }
 0x73c   :  { %v1019_v41 = vadd.f32 %v1014_v40, %v565_v23 }
 0x73d   :  { %2294 = vtanh.f32 %v1020_v39 }
 0x73e   :  { %2296 = vtanh.f32 %v1019_v41 }
 0x73f   :  { %2298 = vrsqrt.f32 %v245_v12  ;;  %v104_v12 = vsel %vm48_vm1, %v45_v9, 0.0 }
 0x747   :  { %v2295_v42 = vpop.eup %2294 }
 0x748   :  { %v2297_v43 = vpop.eup %2296  ;;  %1029 = vrot.lane.b32.xlu1 %v2295_v42, %s2380_s30 }
 0x749   :  { %1027 = vrot.lane.b32.xlu0 %v2297_v43, %s2380_s30  ;;  %v2299_v13 = vpop.eup %2298 }
 0x74a   :  { %v264_v17 = vmul.f32 %v2299_v13, %v136_v60  ;;  %v265_v54 = vmul.f32 %v2299_v13, %v137_v61  ;;  %v40_v60 = vld [vmem:[%s2906_s0 + $0x40] sm:$0xff]  ;;  %v41_v61 = vld [vmem:[%s2906_s0 + $0x48] sm:$0xff]  ;;  %v46_v13 = vld [vmem:[%s2906_s0 + $0x70] sm:$0xff] }
 0x74b   :  { %v85_v62 = vsel %vm48_vm1, %v40_v60, 0.0  ;;  %v86_v63 = vsel %vm48_vm1, %v41_v61, 0.0 }
 0x74c   :  { %v336_v59 = vmul.f32 %v1914_v19, %v264_v17  ;;  %v337_v18 = vmul.f32 %v1914_v19, %v265_v54  ;;  %v87_v2 = vadd.f32 %v86_v63, %v85_v62  ;;  %v97_v17 = vrot.slane %v96_v6, 4  ;;  %v47_v54 = vld [vmem:[%s2906_s0 + $0x78] sm:$0xff] }
 0x74d   :  { %v105_v19 = vadd.f32 %v104_v12, %v103_v11 }
 0x74e   :  { %v408_v20 = vadd.f32 %v1922_v16, %v336_v59  ;;  %v409_v21 = vadd.f32 %v1922_v16, %v337_v18  ;;  %v88_v10 = vrot.slane %v87_v2, 4  ;;  %v112_v59 = vsel %vm48_vm1, %v46_v13, 0.0 }
 0x74f   :  { %v113_v18 = vsel %vm48_vm1, %v47_v54, 0.0 }
 0x750   :  { %2061 = vmatprep.mubr.msk.f32.mxu0 %vm48_vm1, %v408_v20  ;;  %v89_v16 = vadd.f32 %v88_v10, %v87_v2 }
 0x751   :  { %2062 = vmatmul.mubr.msk.f32.gmra.mrb[6].mxu0 %vm48_vm1, %v409_v21  ;;  %v98_v21 = vadd.f32 %v97_v17, %v96_v6 }
 0x7ba   :  { %v1030_v23 = vpop.permute.xlu1 %1029 }
 0x7bb   :  { %v1034_v26 = vmul.f32 %v1030_v23, %v1024_v22  ;;  %v1028_v27 = vpop.permute.xlu0 %1027  ;;  %v106_v22 = vrot.slane %v105_v19, 4  ;;  %v114_v23 = vadd.f32 %v113_v18, %v112_v59 }
 0x7bc   :  { %v1033_v29 = vmul.f32 %v1028_v27, %v1023_v24 }
 0x7bd   :  { %v2631_v30 = vadd.f32 %v1036_v25, %v1034_v26  ;;  %v90_v25 = vrot.slane %v89_v16, 2  ;;  %v99_v26 = vrot.slane %v98_v21, 2  ;;  %v107_v27 = vadd.f32 %v106_v22, %v105_v19 }
 0x7be   :  { %v2633_v31 = vadd.f32 %v1035_v28, %v1033_v29  ;;  %v115_v28 = vrot.slane %v114_v23, 4 }
 0x7bf   :  { %1043 = vrot.lane.b32.xlu1 %v2631_v30, %s2380_s30  ;;  %v91_v29 = vadd.f32 %v90_v25, %v89_v16 }
 0x7c0   :  { %1041 = vrot.lane.b32.xlu0 %v2633_v31, %s2380_s30 }
 0x824   :  { %v2063_v14 = vpop.f32.mrb[6].mxu0 }
 0x825   :  { %v574_v15 = vpop.f32.mrb[7].mxu0  ;;  %v580_v38 = vadd.f32 %v2063_v14, %v2502_v51  ;;  %v116_v14 = vadd.f32 %v115_v28, %v114_v23 }
 0x826   :  { %v575_v39 = vadd.f32 %v2502_v51, %v574_v15  ;;  %v92_v15 = vrot.slane %v91_v29, 1 }
 0x831   :  { %v1044_v35 = vpop.permute.xlu1 %1043 }
 0x832   :  { %v1042_v33 = vpop.permute.xlu0 %1041 }
 0x833   :  { %2117 = vmatprep.mubr.msk.f32.mxu1 %vm634_vm2, %v1042_v33  ;;  %v100_v33 = vadd.f32 %v99_v26, %v98_v21 }
 0x834   :  { %2118 = vmatmul.mubr.msk.f32.vlgmr.msra.gmra.mrb[6].mxu1 %vm634_vm2, %v1044_v35  ;;  %v108_v35 = vrot.slane %v107_v27, 2 }
 0x835   :  { %2218 = vmatpush3.bf16.msra.mxu1 %v2446_v4 }
 0x836   :  { %2220 = vmatprep.subr.bf16.mxu1 %v2457_v8 }
 0x839   :  { %2222 = vmatpush3.bf16.msra.mxu1 %v2457_v8 }
 0x83a   :  { %2232 = vmatprep.subr.bf16.mxu1 %v2446_v4 }
 0x907   :  { %v2119_v32 = vpop.f32.mrb[6].mxu1 }
 0x908   :  { %v1121_v34 = vadd.f32 %v2119_v32, %v2493_v44  ;;  %v1115_v36 = vpop.f32.mrb[7].mxu1  ;;  %v101_v32 = vrot.slane %v100_v33, 1 }
 0x909   :  { %v1116_v37 = vadd.f32 %v2493_v44, %v1115_v36  ;;  %v117_v36 = vrot.slane %v116_v14, 2 }
 0x90a   :  { %1142 = vrot.lane.b32.xlu1 %v1121_v34, %s2379_s27  ;;  %v1125_v40 = vadd.f32 %v1121_v34, %v580_v38  ;;  %v109_v34 = vadd.f32 %v108_v35, %v107_v27 }
 0x90b   :  { %1140 = vrot.lane.b32.xlu0 %v1116_v37, %s2379_s27  ;;  %v1124_v41 = vadd.f32 %v1116_v37, %v575_v39  ;;  %v93_v37 = vadd.f32 %v92_v15, %v91_v29 }
 0x90c   :  { %v1959_v42 = vmul.f32 -1.442695, %v1125_v40  ;;  %v118_v40 = vadd.f32 %v117_v36, %v116_v14 }
 0x90d   :  { %v1958_v43 = vmul.f32 -1.442695, %v1124_v41  ;;  %v126_v41 = vmul.f32 0.0625, %v93_v37 }
 0x90e   :  { %2300 = vpow2.f32 %v1959_v42 }
 0x90f   :  { %2302 = vpow2.f32 %v1958_v43 }
 0x918   :  { %v2301_v45 = vpop.eup %2300 }
 0x919   :  { %v2303_v46 = vpop.eup %2302  ;;  %v1133_v47 = vadd.f32 1.0, %v2301_v45  ;;  %v119_v45 = vrot.slane %v118_v40, 1 }
 0x91a   :  { %v1132_v48 = vadd.f32 1.0, %v2303_v46  ;;  %v2693_v46 = vsub.f32 %v40_v60, %v126_v41 }
 0x91b   :  { %2304 = vrcp.f32 %v1133_v47  ;;  %v2695_v47 = vsub.f32 %v41_v61, %v126_v41 }
 0x91c   :  { %2306 = vrcp.f32 %v1132_v48 }
 0x925   :  { %v2651_v44 = vpop.eup %2304 }
 0x926   :  { %v2653_v50 = vpop.eup %2306 }
 0x97c   :  { %v1143_v49 = vpop.permute.xlu1 %1142 }
 0x97d   :  { %v1147_v52 = vmul.f32 %v2651_v44, %v1143_v49  ;;  %v1141_v51 = vpop.permute.xlu0 %1140 }
 0x97e   :  { %v1146_v53 = vmul.f32 %v2653_v50, %v1141_v51  ;;  %v120_v51 = vadd.f32 %v119_v45, %v118_v40 }
 0x97f   :  { %1152 = vrot.lane.b32.xlu1 %v1147_v52, %s2379_s27 }
 0x980   :  { %1150 = vrot.lane.b32.xlu0 %v1146_v53, %s2379_s27  ;;  %v154_v53 = vmul.f32 %v2693_v46, %v2693_v46  ;;  %v129_v63 = vmul.f32 0.0625, %v120_v51 }
 0x982   :  { %v198_v61 = vsel %vm48_vm1, %v154_v53, 0.0 }
 0x9f1   :  { %v1153_v55 = vpop.permute.xlu1 %1152 }
 0x9f2   :  { %v1157_v56 = vadd.f32 %v1153_v55, %v580_v38  ;;  %v1151_v57 = vpop.permute.xlu0 %1150  ;;  %v102_v38 = vadd.f32 %v101_v32, %v100_v33  ;;  %v155_v55 = vmul.f32 %v2695_v47, %v2695_v47 }
 0x9f3   :  { %v1156_v58 = vadd.f32 %v1151_v57, %v575_v39  ;;  %v110_v39 = vrot.slane %v109_v34, 1 }
 0x9f4   :  { %2308 = vtanh.f32 %v1157_v56  ;;  %v127_v42 = vmul.f32 0.0625, %v102_v38  ;;  %v199_v62 = vsel %vm48_vm1, %v155_v55, 0.0 }
 0x9f5   :  { %2310 = vtanh.f32 %v1156_v58  ;;  %v111_v43 = vadd.f32 %v110_v39, %v109_v34 }
 0x9f6   :  { %v2697_v48 = vsub.f32 %v42_v0, %v127_v42  ;;  %v2699_v49 = vsub.f32 %v43_v1, %v127_v42  ;;  %v200_v0 = vadd.f32 %v199_v62, %v198_v61  ;;  %v1915_v61 = vld [vmem:[%s2907_s1 + $0x4] ss:$0 sm:$0xff] }
 0x9f7   :  { %v128_v52 = vmul.f32 0.0625, %v111_v43 }
 0x9f8   :  { %v156_v56 = vmul.f32 %v2697_v48, %v2697_v48  ;;  %v157_v57 = vmul.f32 %v2699_v49, %v2699_v49  ;;  %v201_v10 = vrot.slane %v200_v0, 4 }
 0x9f9   :  { %v2709_v58 = vsub.f32 %v44_v7, %v128_v52  ;;  %v2711_v60 = vsub.f32 %v45_v9, %v128_v52  ;;  %v2721_v7 = vsub.f32 %v46_v13, %v129_v63  ;;  %v2723_v9 = vsub.f32 %v47_v54, %v129_v63 }
 0x9fa   :  { %v207_v1 = vsel %vm48_vm1, %v156_v56, 0.0  ;;  %v208_v2 = vsel %vm48_vm1, %v157_v57, 0.0  ;;  %v202_v16 = vadd.f32 %v201_v10, %v200_v0 }
 0x9fb   :  { %v158_v3 = vmul.f32 %v2709_v58, %v2709_v58  ;;  %v209_v5 = vadd.f32 %v208_v2, %v207_v1  ;;  %v159_v6 = vmul.f32 %v2711_v60, %v2711_v60  ;;  %v160_v19 = vmul.f32 %v2721_v7, %v2721_v7  ;;  %v1916_v1 = vld [vmem:[%s2907_s1 + $0x5] ss:$0 sm:$0xff]  ;;  %v1923_v2 = vld [vmem:[%s2908_s2 + $0x4] ss:$0 sm:$0xff] }
 0x9fc   :  { %v161_v59 = vmul.f32 %v2723_v9, %v2723_v9  ;;  %v203_v21 = vrot.slane %v202_v16, 2 }
 0x9fd   :  { %v216_v11 = vsel %vm48_vm1, %v158_v3, 0.0  ;;  %v210_v12 = vrot.slane %v209_v5, 4  ;;  %v217_v17 = vsel %vm48_vm1, %v159_v6, 0.0  ;;  %v225_v13 = vsel %vm48_vm1, %v160_v19, 0.0 }
 0x9fe   :  { %v2309_v20 = vpop.eup %2308  ;;  %v218_v18 = vadd.f32 %v217_v17, %v216_v11  ;;  %v226_v54 = vsel %vm48_vm1, %v161_v59, 0.0  ;;  %v204_v25 = vadd.f32 %v203_v21, %v202_v16  ;;  %v1917_v17 = vld [vmem:[%s2907_s1 + $0x6] ss:$0 sm:$0xff] }
 0x9ff   :  { %v2311_v24 = vpop.eup %2310  ;;  %1166 = vrot.lane.b32.xlu1 %v2309_v20, %s2380_s30  ;;  %v211_v20 = vadd.f32 %v210_v12, %v209_v5  ;;  %v227_v23 = vadd.f32 %v226_v54, %v225_v13  ;;  %v1918_v13 = vld [vmem:[%s2907_s1 + $0x7] ss:$0 sm:$0xff] }
 0xa00   :  { %1164 = vrot.lane.b32.xlu0 %v2311_v24, %s2380_s30  ;;  %v219_v22 = vrot.slane %v218_v18, 4  ;;  %v205_v29 = vrot.slane %v204_v25, 1 }
 0xa01   :  { %v212_v24 = vrot.slane %v211_v20, 2  ;;  %v228_v27 = vrot.slane %v227_v23, 4 }
 0xa02   :  { %v220_v26 = vadd.f32 %v219_v22, %v218_v18  ;;  %v206_v15 = vadd.f32 %v205_v29, %v204_v25  ;;  %v1926_v25 = vld [vmem:[%s2908_s2 + $0x7] ss:$0 sm:$0xff] }
 0xa03   :  { %v213_v28 = vadd.f32 %v212_v24, %v211_v20  ;;  %v229_v35 = vadd.f32 %v228_v27, %v227_v23  ;;  %v1925_v20 = vld [vmem:[%s2908_s2 + $0x6] ss:$0 sm:$0xff] }
 0xa04   :  { %v221_v33 = vrot.slane %v220_v26, 2  ;;  %v238_v37 = vmul.f32 0.0625, %v206_v15 }
 0xa05   :  { %v214_v14 = vrot.slane %v213_v28, 1  ;;  %v230_v34 = vrot.slane %v229_v35, 2 }
 0xa06   :  { %v222_v32 = vadd.f32 %v221_v33, %v220_v26  ;;  %v246_v41 = vadd.f32 1e-05, %v238_v37  ;;  %v1160_v33 = vsub.f32 1.0, %v2653_v50 }
 0xa07   :  { %v215_v36 = vadd.f32 %v214_v14, %v213_v28  ;;  %v231_v39 = vadd.f32 %v230_v34, %v229_v35  ;;  %v1173_v35 = vmul.f32 %v2651_v44, %v2631_v30 }
 0xa08   :  { %v223_v38 = vrot.slane %v222_v32, 1  ;;  %2312 = vrsqrt.f32 %v246_v41 }
 0xa09   :  { %v239_v40 = vmul.f32 0.0625, %v215_v36  ;;  %v232_v43 = vrot.slane %v231_v39, 1 }
 0xa0a   :  { %v224_v42 = vadd.f32 %v223_v38, %v222_v32  ;;  %v1172_v32 = vmul.f32 %v2653_v50, %v2633_v31 }
 0xa0b   :  { %v247_v45 = vadd.f32 1e-05, %v239_v40  ;;  %v233_v51 = vadd.f32 %v232_v43, %v231_v39 }
 0xa0c   :  { %v240_v52 = vmul.f32 0.0625, %v224_v42 }
 0xa0d   :  { %2314 = vrsqrt.f32 %v247_v45  ;;  %v241_v55 = vmul.f32 0.0625, %v233_v51 }
 0xa0e   :  { %v248_v53 = vadd.f32 1e-05, %v240_v52  ;;  %v2804_v52 = vld [vmem:[%s2909_s6] ss:$0 sm:$0xff] }
 0xa0f   :  { %v249_v56 = vadd.f32 1e-05, %v241_v55 }
 0xa10   :  { %2316 = vrsqrt.f32 %v248_v53 }
 0xa11   :  { %2318 = vrsqrt.f32 %v249_v56  ;;  %v2813_v56 = vld [vmem:[%s2910_s4] ss:$0 sm:$0xff] }
 0xa12   :  { %v2313_v57 = vpop.eup %2312 }
 0xa13   :  { %v266_v63 = vmul.f32 %v2313_v57, %v2693_v46  ;;  %v267_v0 = vmul.f32 %v2313_v57, %v2695_v47  ;;  %v1924_v46 = vld [vmem:[%s2908_s2 + $0x5] ss:$0 sm:$0xff] }
 0xa15   :  { %v338_v6 = vmul.f32 %v1915_v61, %v266_v63  ;;  %v339_v10 = vmul.f32 %v1915_v61, %v267_v0 }
 0xa17   :  { %v2315_v62 = vpop.eup %2314  ;;  %v410_v19 = vadd.f32 %v1923_v2, %v338_v6  ;;  %v411_v59 = vadd.f32 %v1923_v2, %v339_v10 }
 0xa18   :  { %v268_v3 = vmul.f32 %v2315_v62, %v2697_v48  ;;  %v269_v5 = vmul.f32 %v2315_v62, %v2699_v49 }
 0xa19   :  { %2064 = vmatprep.mubr.msk.f32.mxu0 %vm48_vm1, %v410_v19 }
 0xa1a   :  { %v2317_v11 = vpop.eup %2316  ;;  %v340_v47 = vmul.f32 %v1916_v1, %v268_v3  ;;  %v341_v12 = vmul.f32 %v1916_v1, %v269_v5  ;;  %2065 = vmatmul.mubr.msk.f32.gmra.mrb[8].mxu0 %vm48_vm1, %v411_v59 }
 0xa1b   :  { %v270_v16 = vmul.f32 %v2317_v11, %v2709_v58  ;;  %v271_v48 = vmul.f32 %v2317_v11, %v2711_v60  ;;  %v2319_v49 = vpop.eup %2318 }
 0xa1c   :  { %v412_v18 = vadd.f32 %v1924_v46, %v340_v47  ;;  %v272_v21 = vmul.f32 %v2319_v49, %v2721_v7  ;;  %v413_v58 = vadd.f32 %v1924_v46, %v341_v12  ;;  %v273_v60 = vmul.f32 %v2319_v49, %v2723_v9 }
 0xa1d   :  { %v342_v54 = vmul.f32 %v1917_v17, %v270_v16  ;;  %v343_v22 = vmul.f32 %v1917_v17, %v271_v48  ;;  %v1161_v9 = vsub.f32 1.0, %v2651_v44 }
 0xa1e   :  { %2067 = vmatprep.mubr.msk.f32.mxu0 %vm48_vm1, %v412_v18  ;;  %v344_v24 = vmul.f32 %v1918_v13, %v272_v21  ;;  %v345_v27 = vmul.f32 %v1918_v13, %v273_v60 }
 0xa1f   :  { %v414_v23 = vadd.f32 %v1925_v20, %v342_v54  ;;  %2068 = vmatmul.mubr.msk.f32.gmra.mrb[10].mxu0 %vm48_vm1, %v413_v58  ;;  %v415_v26 = vadd.f32 %v1925_v20, %v343_v22 }
 0xa20   :  { %v416_v7 = vadd.f32 %v1926_v25, %v344_v24  ;;  %v417_v28 = vadd.f32 %v1926_v25, %v345_v27 }
 0xa21   :  { %2070 = vmatprep.mubr.msk.f32.mxu0 %vm48_vm1, %v414_v23 }
 0xa23   :  { %2071 = vmatmul.mubr.msk.f32.gmra.mrb[12].mxu0 %vm48_vm1, %v415_v26 }
 0xa24   :  { %2073 = vmatprep.mubr.msk.f32.mxu0 %vm48_vm1, %v416_v7 }
 0xa27   :  { %2074 = vmatmul.mubr.msk.f32.gmra.mrb[14].mxu0 %vm48_vm1, %v417_v28 }
 0xa71   :  { %v1167_v29 = vpop.permute.xlu1 %1166 }
 0xa72   :  { %v1171_v14 = vmul.f32 %v1167_v29, %v1161_v9  ;;  %v1165_v15 = vpop.permute.xlu0 %1164 }
 0xa73   :  { %v1170_v34 = vmul.f32 %v1165_v15, %v1160_v33 }
 0xa74   :  { %v1175_v36 = vadd.f32 %v1173_v35, %v1171_v14 }
 0xa75   :  { %v2779_v37 = vadd.f32 %v1172_v32, %v1170_v34 }
 0xa76   :  { %1180 = vrot.lane.b32.xlu1 %v1175_v36, %s2380_s30 }
 0xa77   :  { %1178 = vrot.lane.b32.xlu0 %v2779_v37, %s2380_s30 }
 0xae8   :  { %v1181_v39 = vpop.permute.xlu1 %1180 }
 0xae9   :  { %v1179_v38 = vpop.permute.xlu0 %1178 }
 0xaea   :  { %2128 = vmatprep.mubr.msk.f32.mxu0 %vm634_vm2, %v1179_v38 }
 0xaeb   :  { %2129 = vmatmul.mubr.msk.f32.vlgmr.msra.gmra.mrb[16].mxu0 %vm634_vm2, %v1181_v39 }
 0xaec   :  { %2226 = vmatpush3.bf16.msra.mxu0 %v2446_v4 }
 0xaed   :  { %2228 = vmatprep.subr.bf16.mxu0 %v2457_v8  ;;  %v2066_v30 = vpop.f32.mrb[8].mxu0 }
 0xaee   :  { %v584_v31 = vpop.f32.mrb[9].mxu0  ;;  %v590_v57 = vadd.f32 %v2813_v56, %v2066_v30 }
 0xaef   :  { %v585_v61 = vadd.f32 %v2813_v56, %v584_v31 }
 0xaf0   :  { %2230 = vmatpush3.bf16.msra.mxu0 %v2457_v8 }
 0xaf2   :  { %v2789_v44 = vpop.f32.mrb[10].mxu0 }
 0xaf3   :  { %v2791_v50 = vpop.f32.mrb[11].mxu0  ;;  %v600_v33 = vadd.f32 %v2813_v56, %v2789_v44 }
 0xaf6   :  { %v2793_v40 = vpop.f32.mrb[12].mxu0 }
 0xaf7   :  { %v2795_v41 = vpop.f32.mrb[13].mxu0 }
 0xafa   :  { %v2797_v42 = vpop.f32.mrb[14].mxu0 }
 0xafb   :  { %v2799_v43 = vpop.f32.mrb[15].mxu0 }
 0xbbe   :  { %v2130_v45 = vpop.f32.mrb[16].mxu0 }
 0xbbf   :  { %v1258_v51 = vadd.f32 %v2804_v52, %v2130_v45  ;;  %v1252_v53 = vpop.f32.mrb[17].mxu0 }
 0xbc0   :  { %v1253_v55 = vadd.f32 %v2804_v52, %v1252_v53 }
 0xbc1   :  { %1279 = vrot.lane.b32.xlu1 %v1258_v51, %s2379_s27  ;;  %v1262_v62 = vadd.f32 %v1258_v51, %v590_v57 }
 0xbc2   :  { %1277 = vrot.lane.b32.xlu0 %v1253_v55, %s2379_s27  ;;  %v1261_v63 = vadd.f32 %v1253_v55, %v585_v61 }
 0xbc3   :  { %v1963_v0 = vmul.f32 -1.442695, %v1262_v62 }
 0xbc4   :  { %v1962_v1 = vmul.f32 -1.442695, %v1261_v63 }
 0xbc5   :  { %2320 = vpow2.f32 %v1963_v0 }
 0xbc6   :  { %2322 = vpow2.f32 %v1962_v1 }
 0xbcf   :  { %v2321_v2 = vpop.eup %2320 }
 0xbd0   :  { %v2323_v3 = vpop.eup %2322  ;;  %v1270_v5 = vadd.f32 1.0, %v2321_v2 }
 0xbd1   :  { %v1269_v6 = vadd.f32 1.0, %v2323_v3 }
 0xbd2   :  { %2324 = vrcp.f32 %v1270_v5 }
 0xbd3   :  { %2326 = vrcp.f32 %v1269_v6 }
 0xbdc   :  { %v2325_v10 = vpop.eup %2324 }
 0xbdd   :  { %v2327_v11 = vpop.eup %2326  ;;  %v1298_v20 = vsub.f32 1.0, %v2325_v10  ;;  %v1310_v21 = vmul.f32 %v2325_v10, %v1175_v36 }
 0xbde   :  { %v1297_v54 = vsub.f32 1.0, %v2327_v11  ;;  %v1309_v60 = vmul.f32 %v2327_v11, %v2779_v37 }
 0xc33   :  { %v1280_v46 = vpop.permute.xlu1 %1279 }
 0xc34   :  { %v1284_v47 = vmul.f32 %v2325_v10, %v1280_v46  ;;  %v1278_v12 = vpop.permute.xlu0 %1277 }
 0xc35   :  { %v1283_v17 = vmul.f32 %v2327_v11, %v1278_v12 }
 0xc36   :  { %1289 = vrot.lane.b32.xlu1 %v1284_v47, %s2379_s27 }
 0xc37   :  { %1287 = vrot.lane.b32.xlu0 %v1283_v17, %s2379_s27 }
 0xca8   :  { %v1290_v19 = vpop.permute.xlu1 %1289 }
 0xca9   :  { %v1294_v59 = vadd.f32 %v1290_v19, %v590_v57  ;;  %v1288_v16 = vpop.permute.xlu0 %1287 }
 0xcaa   :  { %v1293_v48 = vadd.f32 %v1288_v16, %v585_v61  ;;  %v610_v16 = vadd.f32 %v2813_v56, %v2793_v40 }
 0xcab   :  { %2328 = vtanh.f32 %v1294_v59 }
 0xcac   :  { %2330 = vtanh.f32 %v1293_v48  ;;  %v605_v48 = vadd.f32 %v2813_v56, %v2795_v41 }
 0xcb5   :  { %v2329_v49 = vpop.eup %2328 }
 0xcb6   :  { %v2331_v18 = vpop.eup %2330  ;;  %1303 = vrot.lane.b32.xlu1 %v2329_v49, %s2380_s30 }
 0xcb7   :  { %1301 = vrot.lane.b32.xlu0 %v2331_v18, %s2380_s30 }
 0xd28   :  { %v1304_v13 = vpop.permute.xlu1 %1303 }
 0xd29   :  { %v1308_v58 = vmul.f32 %v1304_v13, %v1298_v20  ;;  %v1302_v22 = vpop.permute.xlu0 %1301 }
 0xd2a   :  { %v1307_v23 = vmul.f32 %v1302_v22, %v1297_v54 }
 0xd2b   :  { %v1312_v24 = vadd.f32 %v1310_v21, %v1308_v58 }
 0xd2c   :  { %v1311_v25 = vadd.f32 %v1309_v60, %v1307_v23 }
 0xd2d   :  { %1317 = vrot.lane.b32.xlu1 %v1312_v24, %s2380_s30 }
 0xd2e   :  { %1315 = vrot.lane.b32.xlu0 %v1311_v25, %s2380_s30 }
 0xd9f   :  { %v1318_v27 = vpop.permute.xlu1 %1317 }
 0xda0   :  { %v1316_v26 = vpop.permute.xlu0 %1315 }
 0xda1   :  { %2139 = vmatprep.mubr.msk.f32.mxu1 %vm634_vm2, %v1316_v26 }
 0xda2   :  { %2140 = vmatmul.mubr.msk.f32.vlgmr.msra.gmra.mrb[8].mxu1 %vm634_vm2, %v1318_v27 }
 0xda3   :  { %2234 = vmatpush3.bf16.msra.mxu1 %v2446_v4  ;;  %v595_v4 = vadd.f32 %v2813_v56, %v2791_v50 }
 0xda4   :  { %2236 = vmatprep.subr.bf16.mxu1 %v2457_v8 }
 0xda7   :  { %2238 = vmatpush3.bf16.msra.mxu1 %v2457_v8 }
 0xe75   :  { %v2141_v7 = vpop.f32.mrb[8].mxu1 }
 0xe76   :  { %v1395_v28 = vadd.f32 %v2804_v52, %v2141_v7  ;;  %v1389_v9 = vpop.f32.mrb[9].mxu1 }
 0xe77   :  { %v1390_v29 = vadd.f32 %v2804_v52, %v1389_v9 }
 0xe78   :  { %1416 = vrot.lane.b32.xlu1 %v1395_v28, %s2379_s27  ;;  %v1399_v35 = vadd.f32 %v1395_v28, %v600_v33 }
 0xe79   :  { %1414 = vrot.lane.b32.xlu0 %v1390_v29, %s2379_s27  ;;  %v1398_v14 = vadd.f32 %v1390_v29, %v595_v4 }
 0xe7a   :  { %v1967_v15 = vmul.f32 -1.442695, %v1399_v35 }
 0xe7b   :  { %v1966_v8 = vmul.f32 -1.442695, %v1398_v14 }
 0xe7c   :  { %2332 = vpow2.f32 %v1967_v15 }
 0xe7d   :  { %2334 = vpow2.f32 %v1966_v8 }
 0xe86   :  { %v2333_v32 = vpop.eup %2332 }
 0xe87   :  { %v2335_v34 = vpop.eup %2334  ;;  %v1407_v36 = vadd.f32 1.0, %v2333_v32 }
 0xe88   :  { %v1406_v37 = vadd.f32 1.0, %v2335_v34 }
 0xe89   :  { %2336 = vrcp.f32 %v1407_v36 }
 0xe8a   :  { %2338 = vrcp.f32 %v1406_v37 }
 0xe93   :  { %v2337_v38 = vpop.eup %2336 }
 0xe94   :  { %v2339_v30 = vpop.eup %2338  ;;  %v1435_v62 = vsub.f32 1.0, %v2337_v38  ;;  %v1447_v1 = vmul.f32 %v2337_v38, %v1312_v24 }
 0xe95   :  { %v1434_v0 = vsub.f32 1.0, %v2339_v30  ;;  %v1446_v5 = vmul.f32 %v2339_v30, %v1311_v25 }
 0xeea   :  { %v1417_v39 = vpop.permute.xlu1 %1416 }
 0xeeb   :  { %v1421_v31 = vmul.f32 %v2337_v38, %v1417_v39  ;;  %v1415_v44 = vpop.permute.xlu0 %1414 }
 0xeec   :  { %v1420_v45 = vmul.f32 %v2339_v30, %v1415_v44 }
 0xeed   :  { %1426 = vrot.lane.b32.xlu1 %v1421_v31, %s2379_s27 }
 0xeee   :  { %1424 = vrot.lane.b32.xlu0 %v1420_v45, %s2379_s27 }
 0xf5f   :  { %v1427_v50 = vpop.permute.xlu1 %1426 }
 0xf60   :  { %v1431_v51 = vadd.f32 %v1427_v50, %v600_v33  ;;  %v1425_v53 = vpop.permute.xlu0 %1424  ;;  %v620_v50 = vadd.f32 %v2813_v56, %v2797_v42 }
 0xf61   :  { %v1430_v55 = vadd.f32 %v1425_v53, %v595_v4 }
 0xf62   :  { %2340 = vtanh.f32 %v1431_v51  ;;  %v615_v51 = vadd.f32 %v2813_v56, %v2799_v43 }
 0xf63   :  { %2342 = vtanh.f32 %v1430_v55 }
 0xf6c   :  { %v2341_v57 = vpop.eup %2340 }
 0xf6d   :  { %v2343_v61 = vpop.eup %2342  ;;  %1440 = vrot.lane.b32.xlu1 %v2341_v57, %s2380_s30 }
 0xf6e   :  { %1438 = vrot.lane.b32.xlu0 %v2343_v61, %s2380_s30 }
 0xfdf   :  { %v1441_v63 = vpop.permute.xlu1 %1440 }
 0xfe0   :  { %v1445_v2 = vmul.f32 %v1441_v63, %v1435_v62  ;;  %v1439_v3 = vpop.permute.xlu0 %1438 }
 0xfe1   :  { %v1444_v6 = vmul.f32 %v1439_v3, %v1434_v0 }
 0xfe2   :  { %v1449_v10 = vadd.f32 %v1447_v1, %v1445_v2 }
 0xfe3   :  { %v1448_v46 = vadd.f32 %v1446_v5, %v1444_v6 }
 0xfe4   :  { %1454 = vrot.lane.b32.xlu1 %v1449_v10, %s2380_s30 }
 0xfe5   :  { %1452 = vrot.lane.b32.xlu0 %v1448_v46, %s2380_s30 }
0x1056   :  { %v1455_v47 = vpop.permute.xlu1 %1454 }
0x1057   :  { %v1453_v11 = vpop.permute.xlu0 %1452 }
0x1058   :  { %2150 = vmatprep.mubr.msk.f32.mxu0 %vm634_vm2, %v1453_v11  ;;  %v1724_v11 = vld [vmem:[%s2911_s7] sm:$0xff] }
0x1059   :  { %2151 = vmatmul.mubr.msk.f32.vlgmr.msra.gmra.mrb[18].mxu0 %vm634_vm2, %v1455_v47  ;;  %v1725_v47 = vld [vmem:[%s2911_s7 + $0x8] sm:$0xff] }
0x112c   :  { %v2152_v12 = vpop.f32.mrb[18].mxu0 }
0x112d   :  { %v1532_v17 = vadd.f32 %v2804_v52, %v2152_v12  ;;  %v1526_v19 = vpop.f32.mrb[19].mxu0  ;;  %v1726_v12 = vld [vmem:[%s2911_s7 + $0x10] sm:$0xff] }
0x112e   :  { %v1527_v59 = vadd.f32 %v2804_v52, %v1526_v19  ;;  %v1727_v19 = vld [vmem:[%s2911_s7 + $0x18] sm:$0xff] }
0x112f   :  { %1553 = vrot.lane.b32.xlu1 %v1532_v17, %s2379_s27  ;;  %v1536_v49 = vadd.f32 %v1532_v17, %v610_v16  ;;  %v2239_v17 = vpack.c.bf16 %v1725_v47, %v1724_v11 }
0x1130   :  { %1551 = vrot.lane.b32.xlu0 %v1527_v59, %s2379_s27  ;;  %v1535_v18 = vadd.f32 %v1527_v59, %v605_v48  ;;  %v2243_v59 = vpack.c.bf16 %v1727_v19, %v1726_v12 }
0x1131   :  { %v1971_v20 = vmul.f32 -1.442695, %v1536_v49  ;;  %2240 = vmatprep.subr.bf16.mxu0 %v2239_v17 }
0x1132   :  { %v1970_v13 = vmul.f32 -1.442695, %v1535_v18  ;;  %2242 = vmatpush3.bf16.msra.mxu0 %v2239_v17 }
0x1133   :  { %2344 = vpow2.f32 %v1971_v20  ;;  %2244 = vmatprep.subr.bf16.mxu0 %v2243_v59 }
0x1134   :  { %2346 = vpow2.f32 %v1970_v13 }
0x1136   :  { %2246 = vmatpush3.bf16.msra.mxu0 %v2243_v59 }
0x113d   :  { %v2345_v54 = vpop.eup %2344 }
0x113e   :  { %v2347_v21 = vpop.eup %2346  ;;  %v1544_v58 = vadd.f32 1.0, %v2345_v54 }
0x113f   :  { %v1543_v22 = vadd.f32 1.0, %v2347_v21 }
0x1140   :  { %2348 = vrcp.f32 %v1544_v58 }
0x1141   :  { %2350 = vrcp.f32 %v1543_v22 }
0x114a   :  { %v2349_v60 = vpop.eup %2348 }
0x114b   :  { %v2351_v24 = vpop.eup %2350  ;;  %v1572_v33 = vsub.f32 1.0, %v2349_v60  ;;  %v1584_v14 = vmul.f32 %v2349_v60, %v1449_v10 }
0x114c   :  { %v1571_v35 = vsub.f32 1.0, %v2351_v24  ;;  %v1583_v32 = vmul.f32 %v2351_v24, %v1448_v46 }
0x11a1   :  { %v1554_v23 = vpop.permute.xlu1 %1553 }
0x11a2   :  { %v1558_v25 = vmul.f32 %v2349_v60, %v1554_v23  ;;  %v1552_v40 = vpop.permute.xlu0 %1551 }
0x11a3   :  { %v1557_v26 = vmul.f32 %v2351_v24, %v1552_v40  ;;  %v1976_v40 = vld [vmem:[%s2912_s8] ss:$0 sm:$0xff]  ;;  %s2381_s8 = smov 126  }
0x11a4   :  { %1563 = vrot.lane.b32.xlu1 %v1558_v25, %s2379_s27 }
0x11a5   :  { %1561 = vrot.lane.b32.xlu0 %v1557_v26, %s2379_s27 }
0x1216   :  { %v1564_v41 = vpop.permute.xlu1 %1563 }
0x1217   :  { %v1568_v27 = vadd.f32 %v1564_v41, %v610_v16  ;;  %v1562_v7 = vpop.permute.xlu0 %1561 }
0x1218   :  { %v1567_v28 = vadd.f32 %v1562_v7, %v605_v48 }
0x1219   :  { %2352 = vtanh.f32 %v1568_v27 }
0x121a   :  { %2354 = vtanh.f32 %v1567_v28 }
0x1223   :  { %v2353_v9 = vpop.eup %2352 }
0x1224   :  { %v2355_v29 = vpop.eup %2354  ;;  %1577 = vrot.lane.b32.xlu1 %v2353_v9, %s2380_s30 }
0x1225   :  { %1575 = vrot.lane.b32.xlu0 %v2355_v29, %s2380_s30 }
0x1296   :  { %v1578_v4 = vpop.permute.xlu1 %1577 }
0x1297   :  { %v1582_v15 = vmul.f32 %v1578_v4, %v1572_v33  ;;  %v1576_v8 = vpop.permute.xlu0 %1575 }
0x1298   :  { %v1581_v34 = vmul.f32 %v1576_v8, %v1571_v35 }
0x1299   :  { %v1586_v36 = vadd.f32 %v1584_v14, %v1582_v15 }
0x129a   :  { %v1585_v37 = vadd.f32 %v1583_v32, %v1581_v34 }
0x129b   :  { %1591 = vrot.lane.b32.xlu1 %v1586_v36, %s2380_s30 }
0x129c   :  { %1589 = vrot.lane.b32.xlu0 %v1585_v37, %s2380_s30 }
0x130d   :  { %v1592_v39 = vpop.permute.xlu1 %1591 }
0x130e   :  { %v1590_v38 = vpop.permute.xlu0 %1589 }
0x130f   :  { %2161 = vmatprep.mubr.msk.f32.mxu1 %vm634_vm2, %v1590_v38 }
0x1310   :  { %2162 = vmatmul.mubr.msk.f32.vlgmr.msra.gmra.mrb[10].mxu1 %vm634_vm2, %v1592_v39 }
0x13e3   :  { %v2163_v30 = vpop.f32.mrb[10].mxu1 }
0x13e4   :  { %v1669_v31 = vadd.f32 %v2804_v52, %v2163_v30  ;;  %v1663_v44 = vpop.f32.mrb[11].mxu1 }
0x13e5   :  { %v1664_v45 = vadd.f32 %v2804_v52, %v1663_v44 }
0x13e6   :  { %1690 = vrot.lane.b32.xlu1 %v1669_v31, %s2379_s27  ;;  %v1673_v53 = vadd.f32 %v1669_v31, %v620_v50 }
0x13e7   :  { %1688 = vrot.lane.b32.xlu0 %v1664_v45, %s2379_s27  ;;  %v1672_v55 = vadd.f32 %v1664_v45, %v615_v51 }
0x13e8   :  { %v1975_v57 = vmul.f32 -1.442695, %v1673_v53 }
0x13e9   :  { %v1974_v61 = vmul.f32 -1.442695, %v1672_v55 }
0x13ea   :  { %2356 = vpow2.f32 %v1975_v57 }
0x13eb   :  { %2358 = vpow2.f32 %v1974_v61 }
0x13f4   :  { %v2357_v62 = vpop.eup %2356 }
0x13f5   :  { %v2359_v63 = vpop.eup %2358  ;;  %v1681_v0 = vadd.f32 1.0, %v2357_v62 }
0x13f6   :  { %v1680_v52 = vadd.f32 1.0, %v2359_v63 }
0x13f7   :  { %2360 = vrcp.f32 %v1681_v0 }
0x13f8   :  { %2362 = vrcp.f32 %v1680_v52 }
0x1401   :  { %v2361_v1 = vpop.eup %2360 }
0x1402   :  { %v2363_v3 = vpop.eup %2362  ;;  %v1709_v49 = vsub.f32 1.0, %v2361_v1  ;;  %v1721_v13 = vmul.f32 %v2361_v1, %v1586_v36 }
0x1403   :  { %v1708_v20 = vsub.f32 1.0, %v2363_v3  ;;  %v1720_v58 = vmul.f32 %v2363_v3, %v1585_v37 }
0x1458   :  { %v1691_v2 = vpop.permute.xlu1 %1690 }
0x1459   :  { %v1695_v5 = vmul.f32 %v2361_v1, %v1691_v2  ;;  %v1689_v42 = vpop.permute.xlu0 %1688 }
0x145a   :  { %v1694_v6 = vmul.f32 %v2363_v3, %v1689_v42 }
0x145b   :  { %1700 = vrot.lane.b32.xlu1 %v1695_v5, %s2379_s27 }
0x145c   :  { %1698 = vrot.lane.b32.xlu0 %v1694_v6, %s2379_s27 }
0x14cd   :  { %v1701_v43 = vpop.permute.xlu1 %1700 }
0x14ce   :  { %v1705_v56 = vadd.f32 %v1701_v43, %v620_v50  ;;  %v1699_v10 = vpop.permute.xlu0 %1698 }
0x14cf   :  { %v1704_v46 = vadd.f32 %v1699_v10, %v615_v51 }
0x14d0   :  { %2364 = vtanh.f32 %v1705_v56 }
0x14d1   :  { %2366 = vtanh.f32 %v1704_v46 }
0x14da   :  { %v2365_v16 = vpop.eup %2364 }
0x14db   :  { %v2367_v48 = vpop.eup %2366  ;;  %1714 = vrot.lane.b32.xlu1 %v2365_v16, %s2380_s30 }
0x14dc   :  { %1712 = vrot.lane.b32.xlu0 %v2367_v48, %s2380_s30 }
0x154d   :  { %v1715_v18 = vpop.permute.xlu1 %1714 }
0x154e   :  { %v1719_v54 = vmul.f32 %v1715_v18, %v1709_v49  ;;  %v1713_v21 = vpop.permute.xlu0 %1712 }
0x154f   :  { %v1718_v22 = vmul.f32 %v1713_v21, %v1708_v20 }
0x1550   :  { %v1723_v60 = vadd.f32 %v1721_v13, %v1719_v54 }
0x1551   :  { %v1722_v23 = vadd.f32 %v1720_v58, %v1718_v22 }
0x1552   :  { %1739 = vrot.lane.b32.xlu1 %v1723_v60, %s2380_s30 }
0x1553   :  { %1737 = vrot.lane.b32.xlu0 %v1722_v23, %s2380_s30  ;;  %s2382_s30 = smov 127  }
0x15c4   :  { %v1740_v25 = vpop.permute.xlu1 %1739 }
0x15c5   :  { %v1738_v24 = vpop.permute.xlu0 %1737 }
0x15c6   :  { %2172 = vmatprep.mubr.msk.f32.mxu0 %vm634_vm2, %v1738_v24 }
0x15c7   :  { %2173 = vmatmul.mubr.msk.f32.vlgmr.msra.gmra.mrb[20].mxu0 %vm634_vm2, %v1740_v25 }
0x169a   :  { %v2174_v26 = vpop.f32.mrb[20].mxu0 }
0x169b   :  { %v1817_v41 = vadd.f32 %v2174_v26, %v1976_v40  ;;  %v1811_v27 = vpop.f32.mrb[21].mxu0 }
0x169c   :  { %v1812_v7 = vadd.f32 %v1976_v40, %v1811_v27 }
0x169d   :  { %v1823_v28 = vsel %vm48_vm1, %v1817_v41, -inf }
0x169e   :  { %1824 = vmax.xlane.f32.xlu1 %v1823_v28  ;;  %v1820_v9 = vsel %vm48_vm1, %v1812_v7, -inf }
0x169f   :  { %1821 = vmax.xlane.f32.xlu0 %v1820_v9 }
0x172b   :  { %v1825_v29 = vpop.xlane.xlu1 %1824 }
0x172c   :  { %v1827_v33 = vsub.f32 %v1817_v41, %v1825_v29  ;;  %v1822_v4 = vpop.xlane.xlu0 %1821 }
0x172d   :  { %v1826_v35 = vsub.f32 %v1812_v7, %v1822_v4 }
0x172e   :  { %v1830_v14 = vmul.f32 1.442695, %v1827_v33 }
0x172f   :  { %v1828_v15 = vmul.f32 1.442695, %v1826_v35 }
0x1731   :  { %2368 = vpow2.f32 %v1828_v15 }
0x1732   :  { %2370 = vpow2.f32 %v1830_v14 }
0x173b   :  { %v2369_v8 = vpop.eup %2368 }
0x173c   :  { %v1832_v32 = vsel %vm48_vm1, %v2369_v8, 0.0  ;;  %v2371_v34 = vpop.eup %2370 }
0x173d   :  { %1833 = vadd.xlane.f32.xlu0 %v1832_v32  ;;  %v1835_v36 = vsel %vm48_vm1, %v2371_v34, 0.0 }
0x1741   :  { %1836 = vadd.xlane.f32.xlu0 %v1835_v36 }
0x17ca   :  { %v1834_v37 = vpop.xlane.xlu0 %1833 }
0x17ce   :  { %v1837_v38 = vpop.xlane.xlu0 %1836 }
0x17cf   :  { %2372 = vrcp.f32 %v1837_v38 }
0x17d0   :  { %2374 = vrcp.f32 %v1834_v37 }
0x17d9   :  { %v2373_v39 = vpop.eup %2372 }
0x17da   :  { %v1841_v30 = vmul.f32 %v2373_v39, %v2371_v34  ;;  %v2375_v31 = vpop.eup %2374 }
0x17db   :  { %v1839_v44 = vmul.f32 %v2375_v31, %v2369_v8 }
0x17dc   :  { %1854 = vrot.lane.b32.xlu1 %v1841_v30, %s2381_s8  ;;  %1846 = vrot.lane.b32.xlu0 %v1841_v30, %s2382_s30 }
0x17e0   :  { %1844 = vrot.lane.b32.xlu1 %v1839_v44, %s2382_s30  ;;  %1860 = vrot.lane.b32.xlu0 %v1839_v44, %s2383_s29 }
0x17e4   :  { %1852 = vrot.lane.b32.xlu1 %v1839_v44, %s2381_s8 }
0x17e8   :  { %1862 = vrot.lane.b32.xlu1 %v1841_v30, %s2383_s29 }
0x184e   :  { %v1855_v45 = vpop.permute.xlu1 %1854  ;;  %v1847_v50 = vpop.permute.xlu0 %1846 }
0x184f   :  { %v1851_v51 = vadd.f32 %v1847_v50, %v1841_v30 }
0x1851   :  { %1872 = vrot.lane.b32.xlu1 %v1851_v51, %s2384_s10  ;;  %v1859_v55 = vadd.f32 %v1855_v45, %v1851_v51 }
0x1852   :  { %v1845_v53 = vpop.permute.xlu1 %1844  ;;  %v1861_v63 = vpop.permute.xlu0 %1860 }
0x1853   :  { %v1850_v57 = vadd.f32 %v1845_v53, %v1839_v44 }
0x1855   :  { %1870 = vrot.lane.b32.xlu0 %v1850_v57, %s2384_s10  ;;  %1880 = vrot.lane.b32.xlu1 %v1859_v55, %s2385_s11 }
0x1856   :  { %v1853_v61 = vpop.permute.xlu1 %1852 }
0x1857   :  { %v1858_v62 = vadd.f32 %v1853_v61, %v1850_v57 }
0x1859   :  { %1878 = vrot.lane.b32.xlu0 %v1858_v62, %s2385_s11  ;;  %v1866_v52 = vadd.f32 %v1861_v63, %v1858_v62 }
0x185a   :  { %v1863_v0 = vpop.permute.xlu1 %1862 }
0x185b   :  { %v1867_v1 = vadd.f32 %v1863_v0, %v1859_v55 }
0x185d   :  { %1888 = vrot.lane.b32.xlu1 %v1867_v1, %s2386_s12  ;;  %1886 = vrot.lane.b32.xlu0 %v1866_v52, %s2386_s12 }
0x18c3   :  { %v1873_v2 = vpop.permute.xlu1 %1872 }
0x18c4   :  { %v1894_v6 = vsel %vm1892_vm3, %v1841_v30, %v1873_v2 }
0x18c7   :  { %v1871_v3 = vpop.permute.xlu0 %1870  ;;  %v1881_v5 = vpop.permute.xlu1 %1880 }
0x18c8   :  { %v1893_v43 = vsel %vm1892_vm3, %v1839_v44, %v1871_v3  ;;  %v1897_v56 = vsel %vm1895_vm4, %v1894_v6, %v1881_v5 }
0x18cb   :  { %v1879_v42 = vpop.permute.xlu0 %1878 }
0x18cc   :  { %v1896_v10 = vsel %vm1895_vm4, %v1893_v43, %v1879_v42 }
0x18cf   :  { %v1889_v46 = vpop.permute.xlu1 %1888  ;;  %v1887_v11 = vpop.permute.xlu0 %1886 }
0x18d0   :  { %v1900_v47 = vsel %vm1898_vm5, %v1897_v56, %v1889_v46  ;;  %v1899_v12 = vsel %vm1898_vm5, %v1896_v10, %v1887_v11 }
0x18d1   :  { %v1902_v17 = vmax.f32 %v1900_v47, 5e-08  ;;  %v1901_v19 = vmax.f32 %v1899_v12, 5e-08 }
0x18d3   :  { %v1904_v59 = vmin.f32 %v1902_v17, 0.99999994  ;;  %v1903_v16 = vmin.f32 %v1901_v19, 0.99999994 }
0x18d5   :  { %1906 = vst.msk [vmem:[%s2913_s9 + $0x8] sm:$0xff] %vm48_vm1, %v1904_v59  ;;  %1905 = vst.msk [vmem:[%s2913_s9] sm:$0xff] %vm48_vm1, %v1903_v16 }

</bundles_post_ra>
